<compile_context>
chip_gen: v5e
topology: v5e:2x2
jax: 0.10.0
libtpu: 0.0.40
codegen_flags: <defaults>
</compile_context>

<pallas_src>
import functools

import jax
import jax.numpy as jnp
from jax.experimental import pallas as pl
from jax.experimental.pallas import tpu as pltpu

BN_EPS = 1e-5


# ------------------------------ Fused kernel --------------------------------
def encoder_kernel(patches_ref, wc_ref, bc_ref, wp_ref, bp_ref,
                   out_ref, acc_ref, *, inv_p):
    # patches: [TILE_P, K_pad] bf16   (one P-tile of one batch element)
    # wc:      [K_pad, C_feat] bf16   (im2col conv weights, zero-padded rows)
    # bc:      [1, C_feat] f32
    # wp:      [C_feat, E]  bf16      (BN(eval) already folded in)
    # bp:      [1, E] f32             (BN(eval) already folded in)
    # out:     [1, E] f32             (written only on the last P step)
    # acc:     [1, C_feat] f32 VMEM scratch (pooled-sum accumulator)
    p = pl.program_id(1)

    @pl.when(p == 0)
    def _():
        acc_ref[...] = jnp.zeros_like(acc_ref)

    # Conv-as-matmul on the MXU (bf16 inputs, f32 accumulation).
    conv = jnp.dot(patches_ref[...], wc_ref[...],
                   preferred_element_type=jnp.float32)          # [TILE_P, C_feat]
    conv = jnp.maximum(conv + bc_ref[...], 0.0)                 # bias + ReLU
    # Accumulate the spatial sum; divide by P once at finalize.
    acc_ref[...] += jnp.sum(conv, axis=0, keepdims=True)        # [1, C_feat]

    @pl.when(p == pl.num_programs(1) - 1)
    def _():
        feat = acc_ref[...] * inv_p                             # global avg pool
        # Projection head: Linear (+folded BN eval) -> ReLU -> Dropout(eval)=id
        y = jnp.dot(feat.astype(jnp.bfloat16), wp_ref[...],
                    preferred_element_type=jnp.float32)         # [1, E]
        y = jnp.maximum(y + bp_ref[...], 0.0)
        out_ref[...] = y


# --------------------------------- Wrappers ---------------------------------
def im2col_3x3(x_nhwc, k_pad):
    """3x3 patches with padding=1, stride=1. Returns [B, H*W, k_pad]."""
    B, H, W, C = x_nhwc.shape
    xp = jnp.pad(x_nhwc, ((0, 0), (1, 1), (1, 1), (0, 0)))
    cols = [xp[:, dh:dh + H, dw:dw + W, :] for dh in range(3) for dw in range(3)]
    patches = jnp.concatenate(cols, axis=-1).reshape(B, H * W, 9 * C)
    k = 9 * C
    if k_pad > k:
        patches = jnp.pad(patches, ((0, 0), (0, 0), (0, k_pad - k)))
    return patches


def _choose_tile_p(p, k_pad, vmem_budget_bytes=4 * 1024 * 1024):
    """Largest divisor of P, multiple of 8 (or P itself), that fits the budget.

    Budget accounts for the bf16 patch tile being double-buffered.
    """
    cap = max(8, vmem_budget_bytes // (k_pad * 2 * 2))
    for t in range(min(p, cap), 0, -1):
        if p % t == 0 and (t % 8 == 0 or t == p):
            return t
    return p


def fold_batchnorm(params):
    """Fold eval-mode BatchNorm1d into the projection Linear (one-time)."""
    inv_std = 1.0 / jnp.sqrt(params["running_var"] + BN_EPS)     # [1, E]
    scale = params["gamma"] * inv_std                            # [1, E]
    wp_f = params["wp"] * scale                                  # [C_feat, E]
    bp_f = (params["bp"] - params["running_mean"]) * scale + params["beta"]
    return wp_f, bp_f


def encoder_cnn_forward(images_nchw, params, *, tile_p=None):
    """images_nchw: [B, 3, H, W] float32 -> [B, embed_size] float32."""
    B, C_in, H, W = images_nchw.shape
    P = H * W
    K = params["wc"].shape[0]                      # 9 * C_in
    KP = max(32, ((K + 7) // 8) * 8)               # pad contraction dim (27 -> 32)
    c_feat = params["wc"].shape[1]
    embed = params["wp"].shape[1]

    # NCHW -> NHWC, im2col, pad K, cast matmul operands to bf16.
    x_nhwc = jnp.transpose(images_nchw, (0, 2, 3, 1))
    patches = im2col_3x3(x_nhwc, KP).astype(jnp.bfloat16)            # [B, P, KP]
    wc = jnp.pad(params["wc"], ((0, KP - K), (0, 0))).astype(jnp.bfloat16)

    # Fold BN(eval) into the projection Linear once (parameter fold).
    wp_f, bp_f = fold_batchnorm(params)
    wp_f = wp_f.astype(jnp.bfloat16)

    if tile_p is None:
        tile_p = _choose_tile_p(P, KP)
    n_p = P // tile_p

    kernel = functools.partial(encoder_kernel, inv_p=1.0 / float(P))

    out3 = pl.pallas_call(
        kernel,
        out_shape=jax.ShapeDtypeStruct((B, 1, embed), jnp.float32),
        grid_spec=pltpu.PrefetchScalarGridSpec(
            num_scalar_prefetch=0,
            grid=(B, n_p),
            in_specs=[
                # One P-tile of one batch element; B dim squeezed -> 2-D matmul.
                pl.BlockSpec((None, tile_p, KP), lambda b, p: (b, p, 0)),
                pl.BlockSpec((KP, c_feat), lambda b, p: (0, 0)),
                pl.BlockSpec((1, c_feat), lambda b, p: (0, 0)),
                pl.BlockSpec((c_feat, embed), lambda b, p: (0, 0)),
                pl.BlockSpec((1, embed), lambda b, p: (0, 0)),
            ],
            # Same block index across the P axis -> resident output, written at
            # the last P step only.
            out_specs=pl.BlockSpec((None, 1, embed), lambda b, p: (b, 0, 0)),
            scratch_shapes=[pltpu.VMEM((1, c_feat), jnp.float32)],
        ),
        compiler_params=pltpu.CompilerParams(
            dimension_semantics=("parallel", "arbitrary"),
            vmem_limit_bytes=32 * 1024 * 1024,
        ),
    )(patches, wc, params["bc"], wp_f, bp_f)

    return out3.reshape(B, embed)


def init_params(key, c_in=3, in_features=256, embed_size=256):
    k = 9 * c_in
    k1, k2, k3, k4, k5, k6 = jax.random.split(key, 6)
    params = {
        # backbone stand-in conv (im2col layout [K, C_feat])
        "wc": jax.random.normal(k1, (k, in_features), jnp.float32) * 0.1,
        "bc": jax.random.normal(k2, (1, in_features), jnp.float32) * 0.01,
        # projection Linear(in_features, embed_size)
        "wp": jax.random.normal(k3, (in_features, embed_size), jnp.float32)
              * (1.0 / jnp.sqrt(in_features)),
        "bp": jax.random.normal(k4, (1, embed_size), jnp.float32) * 0.01,
        # BatchNorm1d(embed_size) affine + running stats (eval mode)
        "gamma": jnp.ones((1, embed_size), jnp.float32)
                 + 0.05 * jax.random.normal(k5, (1, embed_size), jnp.float32),
        "beta": 0.05 * jax.random.normal(k6, (1, embed_size), jnp.float32),
        "running_mean": jnp.zeros((1, embed_size), jnp.float32),
        "running_var": jnp.ones((1, embed_size), jnp.float32),
    }
    return params


if __name__ == "__main__":
    key = jax.random.PRNGKey(0)
    k_img, k_par = jax.random.split(key)

    B, C_IN, H, W = 2, 3, 32, 32          # small synthetic image batch (NCHW)
    IN_FEATURES, EMBED = 256, 256         # backbone feature dim, embed_size

    images = jax.random.normal(k_img, (B, C_IN, H, W), jnp.float32)
    params = init_params(k_par, c_in=C_IN, in_features=IN_FEATURES,
                         embed_size=EMBED)

    out = encoder_cnn_forward(images, params)
    out = jax.block_until_ready(out)

    assert out.shape == (B, EMBED), out.shape
    assert out.dtype == jnp.float32
    assert bool(jnp.all(jnp.isfinite(out)))
    print("KERNEL_OK")
</pallas_src>

<mosaic_0001>
module attributes {stable_mosaic.version = 11 : i64} {
  func.func @encoder_kernel(%arg0: i32, %arg1: i32, %arg2: memref<1x1024x32xbf16, #tpu.memory_space<vmem>>, %arg3: memref<32x256xbf16, #tpu.memory_space<vmem>>, %arg4: memref<1x256xf32, #tpu.memory_space<vmem>>, %arg5: memref<256x256xbf16, #tpu.memory_space<vmem>>, %arg6: memref<1x256xf32, #tpu.memory_space<vmem>>, %arg7: memref<1x1x256xf32, #tpu.memory_space<vmem>>, %arg8: memref<1x256xf32, #tpu.memory_space<vmem>>) attributes {dimension_semantics = [#tpu.dimension_semantics<parallel>, #tpu.dimension_semantics<arbitrary>], iteration_bounds = array<i64: 2, 1>, scalar_prefetch = 0 : i64, scratch_operands = 1 : i64, tpu.core_type = #tpu.core_type<tc>, window_params = [{transform_indices = @transform_0, window_bounds = array<i64: 1, 1024, 32>}, {pipeline_mode = #tpu.pipeline_mode<synchronous>, transform_indices = @transform_1, window_bounds = array<i64: 32, 256>}, {pipeline_mode = #tpu.pipeline_mode<synchronous>, transform_indices = @transform_2, window_bounds = array<i64: 1, 256>}, {pipeline_mode = #tpu.pipeline_mode<synchronous>, transform_indices = @transform_3, window_bounds = array<i64: 256, 256>}, {pipeline_mode = #tpu.pipeline_mode<synchronous>, transform_indices = @transform_4, window_bounds = array<i64: 1, 256>}, {transform_indices = @transform_5, window_bounds = array<i64: 1, 1, 256>}]} {
    %c0_i32 = arith.constant 0 : i32
    %0 = arith.cmpi eq, %arg1, %c0_i32 : i32
    %1 = arith.extui %0 : i1 to i32
    %c0_i32_0 = arith.constant 0 : i32
    %2 = arith.cmpi ne, %1, %c0_i32_0 : i32
    scf.if %2 {
      %cst_15 = arith.constant 0.000000e+00 : f32
      %20 = vector.broadcast %cst_15 : f32 to vector<1x256xf32>
      %c0_16 = arith.constant 0 : index
      %c0_17 = arith.constant 0 : index
      %21 = vector.load %arg8[%c0_16, %c0_17] : memref<1x256xf32, #tpu.memory_space<vmem>>, vector<1x256xf32>
      tpu.vector_store %arg8[%c0_16, %c0_17], %20 {strides = array<i32>} : memref<1x256xf32, #tpu.memory_space<vmem>>, vector<1x256xf32>,
    } else {
    }
    %c0 = arith.constant 0 : index
    %c0_1 = arith.constant 0 : index
    %c0_2 = arith.constant 0 : index
    %3 = vector.load %arg2[%c0, %c0_1, %c0_2] : memref<1x1024x32xbf16, #tpu.memory_space<vmem>>, vector<1x1024x32xbf16>
    %4 = vector.shape_cast %3 : vector<1x1024x32xbf16> to vector<1024x32xbf16>
    %c0_3 = arith.constant 0 : index
    %c0_4 = arith.constant 0 : index
    %5 = vector.load %arg3[%c0_3, %c0_4] : memref<32x256xbf16, #tpu.memory_space<vmem>>, vector<32x256xbf16>
    %cst = arith.constant dense<0.000000e+00> : vector<1024x256xf32>
    %6 = tpu.matmul %4, %5, %cst {dimension_numbers = #tpu.dot_dimension_numbers<[1], [0], [0], [1], [0, 0, 1, 1], [], []>} : vector<1024x32xbf16>, vector<32x256xbf16>, vector<1024x256xf32> -> vector<1024x256xf32>
    %c0_5 = arith.constant 0 : index
    %c0_6 = arith.constant 0 : index
    %7 = vector.load %arg4[%c0_5, %c0_6] : memref<1x256xf32, #tpu.memory_space<vmem>>, vector<1x256xf32>
    %8 = vector.broadcast %7 : vector<1x256xf32> to vector<1024x256xf32>
    %9 = arith.addf %6, %8 : vector<1024x256xf32>
    %cst_7 = arith.constant 0.000000e+00 : f32
    %10 = vector.broadcast %cst_7 : f32 to vector<1024x256xf32>
    %11 = arith.maximumf %9, %10 : vector<1024x256xf32>
    %c0_8 = arith.constant 0 : index
    %c0_9 = arith.constant 0 : index
    %12 = vector.load %arg8[%c0_8, %c0_9] : memref<1x256xf32, #tpu.memory_space<vmem>>, vector<1x256xf32>
    %cst_10 = arith.constant dense<0.000000e+00> : vector<256xf32>
    %13 = vector.multi_reduction <add>, %11, %cst_10 [0] : vector<1024x256xf32> to vector<256xf32>
    %14 = vector.shape_cast %13 : vector<256xf32> to vector<1x256xf32>
    %15 = arith.addf %12, %14 : vector<1x256xf32>
    %c0_11 = arith.constant 0 : index
    %c0_12 = arith.constant 0 : index
    %16 = vector.load %arg8[%c0_11, %c0_12] : memref<1x256xf32, #tpu.memory_space<vmem>>, vector<1x256xf32>
    tpu.vector_store %arg8[%c0_11, %c0_12], %15 {strides = array<i32>} : memref<1x256xf32, #tpu.memory_space<vmem>>, vector<1x256xf32>,
    %c0_i32_13 = arith.constant 0 : i32
    %17 = arith.cmpi eq, %arg1, %c0_i32_13 : i32
    %18 = arith.extui %17 : i1 to i32
    %c0_i32_14 = arith.constant 0 : i32
    %19 = arith.cmpi ne, %18, %c0_i32_14 : i32
    scf.if %19 {
      %c0_15 = arith.constant 0 : index
      %c0_16 = arith.constant 0 : index
      %20 = vector.load %arg8[%c0_15, %c0_16] : memref<1x256xf32, #tpu.memory_space<vmem>>, vector<1x256xf32>
      %cst_17 = arith.constant 9.765625E-4 : f32
      %21 = vector.broadcast %cst_17 : f32 to vector<1x256xf32>
      %22 = arith.mulf %20, %21 : vector<1x256xf32>
      %23 = arith.truncf %22 : vector<1x256xf32> to vector<1x256xbf16>
      %c0_18 = arith.constant 0 : index
      %c0_19 = arith.constant 0 : index
      %24 = vector.load %arg5[%c0_18, %c0_19] : memref<256x256xbf16, #tpu.memory_space<vmem>>, vector<256x256xbf16>
      %cst_20 = arith.constant dense<0.000000e+00> : vector<1x256xf32>
      %25 = tpu.matmul %23, %24, %cst_20 {dimension_numbers = #tpu.dot_dimension_numbers<[1], [0], [0], [1], [0, 0, 1, 1], [], []>} : vector<1x256xbf16>, vector<256x256xbf16>, vector<1x256xf32> -> vector<1x256xf32>
      %c0_21 = arith.constant 0 : index
      %c0_22 = arith.constant 0 : index
      %26 = vector.load %arg6[%c0_21, %c0_22] : memref<1x256xf32, #tpu.memory_space<vmem>>, vector<1x256xf32>
      %27 = arith.addf %25, %26 : vector<1x256xf32>
      %cst_23 = arith.constant 0.000000e+00 : f32
      %28 = vector.broadcast %cst_23 : f32 to vector<1x256xf32>
      %29 = arith.maximumf %27, %28 : vector<1x256xf32>
      %c0_24 = arith.constant 0 : index
      %c0_25 = arith.constant 0 : index
      %c0_26 = arith.constant 0 : index
      %30 = vector.load %arg7[%c0_24, %c0_25, %c0_26] : memref<1x1x256xf32, #tpu.memory_space<vmem>>, vector<1x1x256xf32>
      %31 = vector.shape_cast %30 : vector<1x1x256xf32> to vector<1x256xf32>
      %32 = vector.shape_cast %29 : vector<1x256xf32> to vector<1x1x256xf32>
      tpu.vector_store %arg7[%c0_24, %c0_25, %c0_26], %32 {strides = array<i32>} : memref<1x1x256xf32, #tpu.memory_space<vmem>>, vector<1x1x256xf32>,
    } else {
    }
    return
  }
  func.func @transform_0(%arg0: i32, %arg1: i32) -> (i32, i32, i32) {
    %c0_i32 = arith.constant 0 : i32
    %c0_i32_0 = arith.constant 0 : i32
    return %arg0, %arg1, %c0_i32 : i32, i32, i32
  }
  func.func @transform_1(%arg0: i32, %arg1: i32) -> (i32, i32) {
    %c0_i32 = arith.constant 0 : i32
    %c0_i32_0 = arith.constant 0 : i32
    %c0_i32_1 = arith.constant 0 : i32
    return %c0_i32, %c0_i32_0 : i32, i32
  }
  func.func @transform_2(%arg0: i32, %arg1: i32) -> (i32, i32) {
    %c0_i32 = arith.constant 0 : i32
    %c0_i32_0 = arith.constant 0 : i32
    %c0_i32_1 = arith.constant 0 : i32
    return %c0_i32, %c0_i32_0 : i32, i32
  }
  func.func @transform_3(%arg0: i32, %arg1: i32) -> (i32, i32) {
    %c0_i32 = arith.constant 0 : i32
    %c0_i32_0 = arith.constant 0 : i32
    %c0_i32_1 = arith.constant 0 : i32
    return %c0_i32, %c0_i32_0 : i32, i32
  }
  func.func @transform_4(%arg0: i32, %arg1: i32) -> (i32, i32) {
    %c0_i32 = arith.constant 0 : i32
    %c0_i32_0 = arith.constant 0 : i32
    %c0_i32_1 = arith.constant 0 : i32
    return %c0_i32, %c0_i32_0 : i32, i32
  }
  func.func @transform_5(%arg0: i32, %arg1: i32) -> (i32, i32, i32) {
    %c0_i32 = arith.constant 0 : i32
    %c0_i32_0 = arith.constant 0 : i32
    %c0_i32_1 = arith.constant 0 : i32
    return %arg0, %c0_i32, %c0_i32_0 : i32, i32, i32
  }
}

</mosaic_0001>

<bundles_post_ra>
// kernel: tpu_custom_call.1
= control target key start
LH: loop header
LB: loop body
LE: loop exit
PB: predicated region body
PF: predicated region fallthrough
CT: control target
= control target key end

     0   :  { %10 = vsyncpa [#allocation4], 0  ;;  %s4429_s0 = inlined_call_operand.vmem [shape: bf16[2,1024,32], index: 0, kind: input, shape index: {}]   ;;  %s4430_s1 = inlined_call_operand.vmem [shape: bf16[32,256], index: 1, kind: input, shape index: {}]   ;;  %s4431_s2 = inlined_call_operand.vmem [shape: f32[1,256], index: 2, kind: input, shape index: {}]   ;;  %s4432_s3 = inlined_call_operand.vmem [shape: bf16[256,256], index: 3, kind: input, shape index: {}]   ;;  %s4433_s4 = inlined_call_operand.vmem [shape: f32[1,256], index: 4, kind: input, shape index: {}]   ;;  %s4434_s5 = inlined_call_operand.hbm [shape: f32[2,1,256], index: 5, kind: output, shape index: {}]  }
   0x1   :  { %12 = vsyncpa [#allocation4 + $0x1], 0  ;;  %s3296_s18 = smov 0   ;;  %s3298_s19 = smov 0  }
   0x2   :  { %s3300_s20 = smov 0   ;;  %s3302_s21 = smov 0  }
   0x3   :  { %s3304_s22 = smov 0   ;;  %s3306_s23 = smov 0  }
   0x4 LB: > { %s2484_s24 = sadd.s32 4294967295, %s3263_s23   ;;  %s2485_s25 = sadd.s32 4294967294, %s3263_s23   ;;  %s3263_s23 = sphi %s3306_s23, %s18_s23   ;;  %s3259_s22 = sphi %s3304_s22, %s4571_s22   ;;  %s3255_s21 = sphi %s3302_s21, %s4570_s21   ;;  %s3251_s20 = sphi %s3300_s20, %s4569_s20   ;;  %s3247_s19 = sphi %s3298_s19, %s4568_s19   ;;  %s3243_s18 = sphi %s3296_s18, %s4567_s18  }
   0x5   : > { %s30_s26 = sadd.s32 1, %s3259_s22  ;;  %s149_s27 = sadd.s32 1, %s3251_s20 }
   0x6   : > { %p32_p0 = scmp.ge.s32.totalorder %s30_s26, 2  ;;  %p159_p1 = scmp.ne.s32.totalorder %s3251_s20, %s3247_s19 }
   0x7   : > { %p160_p2 = scmp.eq.s32.totalorder %s2484_s24, 1  ;;  %p165_p3 = scmp.ne.s32.totalorder %s3247_s19, %s3243_s18 }
   0x8   : > { %s4573_s26 = smov (%p32_p0, %s30_s26), 0  ;;  %p166_p5 = scmp.eq.s32.totalorder %s2485_s25, 1 }
   0x9   : > { %p3336_p4 = por %p160_p2, %p159_p1  ;;  %s146_s29 = ssub.s32 %s3259_s22, %s4573_s26 }
   0xa   : > { %p2488_p6 = scmp.ge.s32.totalorder %s3263_s23, 1  ;;  %p147_p7 = scmp.eq.s32.totalorder %s146_s29, 0 }
   0xb   : > { %p3343_p8 = por %p166_p5, %p165_p3  ;;  %p209_p9 = scmp.lt.s32.totalorder %s3263_s23, 3 }
   0xc   : > { %s3349_s6 = scalar_select %p147_p7, %s3251_s20, %s149_s27  }
   0xd   : > { %p210_p10 = pnand %p2488_p6, %p209_p9 }
   0xf   : > { %213 = sbr.rel (%p210_p10) target bundleno = 1010 (0x3f2), region = 40 }
  0x14   : > { %v2758_v0 = vld [vmem:[%s4430_s1 + $0x10] sm:$0xf]  ;;  %v3092_v1 = vld [vmem:[%s4430_s1 + $0x14] sm:$0xf0]  ;;  %v3091_v2 = vld [vmem:[%s4430_s1 + $0x14] sm:$0xf] }
  0x15   : > { %v2759_v3 = vor.u32 %v3092_v1, %v2758_v0  ;;  %v2760_v4 = vld [vmem:[%s4430_s1 + $0x18] sm:$0xf0]  ;;  %v2750_v5 = vld [vmem:[%s4430_s1] sm:$0xf]  ;;  %v3090_v6 = vld [vmem:[%s4430_s1 + $0x4] sm:$0xf0] }
  0x16   : > { %v2763_v7 = vor.u32 %v3091_v2, %v2760_v4  ;;  %v3089_v8 = vld [vmem:[%s4430_s1 + $0x4] sm:$0xf]  ;;  %v2752_v9 = vld [vmem:[%s4430_s1 + $0x8] sm:$0xf0]  ;;  %p242_p11 = scmp.lt.s32.totalorder %s3255_s21, 1  ;;  %v2751_v10 = vor.u32 %v3090_v6, %v2750_v5  ;;  %vm739_vm0 = vcmask 261120  }
  0x17   : > { %938 = vmatpush.bf16.msra.mxu0 %v2759_v3  ;;  %3125 = vmatpush.bf16.msra.mxu2 %v2759_v3  ;;  %v2755_v11 = vor.u32 %v3089_v8, %v2752_v9  ;;  %v393_v22 = vld [vmem:[%s4431_s2] sm:$0x3]  ;;  %vm2116_vm2 = vcmask 1040384   ;;  %s238_s13 = sand.u32 1, %s3247_s19   ;;  %s3021_s15 = sshll.u32 %s3255_s21, 1 }
  0x18   : > { %1267 = vmatpush.bf16.msra.mxu1 %v2763_v7  ;;  %s243_s8 = scalar_select %p242_p11, %s3255_s21, 1  ;;  %3127 = vmatpush.bf16.msra.mxu3 %v2763_v7  ;;  %v3410_v24 = vperm.slane %v393_v22, 0  ;;  %v3413_v25 = vperm.slane %v393_v22, 1 }
  0x19   : > { %s2489_s14 = sshll.u32 %s238_s13, 1  ;;  %s2396_s21 = scalar_lea.sflag [#allocation4], %s238_s13 }
  0x1a   : > { %s3024_s9 = sshll.u32 %s243_s8, 9  ;;  %s240_s24 = scalar_lea.vmem [#allocation3], %s2489_s14 }
  0x1b   : > { %939 = vmatpush.bf16.msra.mxu0 %v2751_v10  ;;  %s3380_s12 = scalar_lea.vmem %s4429_s0, %s3024_s9  ;;  %3126 = vmatpush.bf16.msra.mxu2 %v2751_v10  ;;  %s2408_s25 = sshll.u32 %s240_s24, 4  ;;  %s2409_s25 = int_to_ptr.vmem [resolvable:$true] %s2408_s25 }
  0x1c   : > { %1268 = vmatpush.bf16.msra.mxu1 %v2755_v11  ;;  %v3025_v12 = vld [vmem:[%s3380_s12] sm:$0xff]  ;;  %3128 = vmatpush.bf16.msra.mxu3 %v2755_v11  ;;  %v3026_v13 = vld [vmem:[%s3380_s12 + $0x8] sm:$0xff]  ;;  %v3027_v14 = vld [vmem:[%s3380_s12 + $0x10] sm:$0xff]  ;;  %s3205_s10 = scalar_lea.hbm %s4434_s5, 4 }
  0x1d   : > { %v3028_v15 = vld [vmem:[%s3380_s12 + $0x18] sm:$0xff]  ;;  %v3029_v16 = vld [vmem:[%s3380_s12 + $0x20] sm:$0xff]  ;;  %v3030_v17 = vld [vmem:[%s3380_s12 + $0x28] sm:$0xff] }
  0x1e   : > { %2764 = vmatmul.msk.bf16.vlgmr.msra.gmra.mxu0 %vm739_vm0, %v3025_v12  ;;  %v3031_v18 = vld [vmem:[%s3380_s12 + $0x30] sm:$0xff]  ;;  %v3032_v19 = vld [vmem:[%s3380_s12 + $0x38] sm:$0xff]  ;;  %v3033_v20 = vld [vmem:[%s3380_s12 + $0x40] sm:$0xff] }
  0x1f   : > { %2828 = vmatmul.msk.bf16.vlgmr.msra.gmra.mxu1 %vm739_vm0, %v3025_v12  ;;  %v3059_v36 = vld [vmem:[%s3380_s12 + $0x110] sm:$0xff]  ;;  %v3034_v39 = vld [vmem:[%s3380_s12 + $0x48] sm:$0xff]  ;;  %v3060_v54 = vld [vmem:[%s3380_s12 + $0x118] sm:$0xff] }
  0x20   : > { %2862 = vmatmul.msk.bf16.vlgmr.msra.gmra.mxu3 %vm739_vm0, %v3059_v36  ;;  %2798 = vmatmul.msk.bf16.vlgmr.msra.gmra.mxu2 %vm739_vm0, %v3059_v36  ;;  %v3035_v57 = vld [vmem:[%s3380_s12 + $0x50] sm:$0xff]  ;;  %v3061_v8 = vld [vmem:[%s3380_s12 + $0x120] sm:$0xff]  ;;  %v3036_v11 = vld [vmem:[%s3380_s12 + $0x58] sm:$0xff] }
  0x2e   : > { %2765 = vmatmul.msk.bf16.gmra.mxu0 %vm739_vm0, %v3026_v13 }
  0x2f   : > { %2829 = vmatmul.msk.bf16.gmra.mxu1 %vm739_vm0, %v3026_v13 }
  0x30   : > { %2863 = vmatmul.msk.bf16.gmra.mxu3 %vm739_vm0, %v3060_v54  ;;  %2799 = vmatmul.msk.bf16.gmra.mxu2 %vm739_vm0, %v3060_v54 }
  0x3e   : > { %2766 = vmatmul.msk.bf16.gmra.mxu0 %vm739_vm0, %v3027_v14 }
  0x3f   : > { %2830 = vmatmul.msk.bf16.gmra.mxu1 %vm739_vm0, %v3027_v14 }
  0x40   : > { %2864 = vmatmul.msk.bf16.gmra.mxu3 %vm739_vm0, %v3061_v8  ;;  %2800 = vmatmul.msk.bf16.gmra.mxu2 %vm739_vm0, %v3061_v8 }
  0x4e   : > { %2767 = vmatmul.msk.bf16.gmra.mxu0 %vm739_vm0, %v3028_v15 }
  0x4f   : > { %2831 = vmatmul.msk.bf16.gmra.mxu1 %vm739_vm0, %v3028_v15 }
  0x5e   : > { %2768 = vmatmul.msk.bf16.gmra.mxu0 %vm739_vm0, %v3029_v16 }
  0x5f   : > { %2832 = vmatmul.msk.bf16.gmra.mxu1 %vm739_vm0, %v3029_v16 }
  0x6e   : > { %2769 = vmatmul.msk.bf16.gmra.mxu0 %vm739_vm0, %v3030_v17 }
  0x6f   : > { %2833 = vmatmul.msk.bf16.gmra.mxu1 %vm739_vm0, %v3030_v17 }
  0x7e   : > { %2770 = vmatmul.msk.bf16.gmra.mxu0 %vm739_vm0, %v3031_v18 }
  0x7f   : > { %2834 = vmatmul.msk.bf16.gmra.mxu1 %vm739_vm0, %v3031_v18 }
  0x8e   : > { %2771 = vmatmul.msk.bf16.gmra.mxu0 %vm739_vm0, %v3032_v19 }
  0x8f   : > { %2835 = vmatmul.msk.bf16.gmra.mxu1 %vm739_vm0, %v3032_v19 }
  0x9b   : > { %v941_v21 = vpop.f32.mrf.mxu0 }
  0x9c   : > { %v1270_v23 = vpop.f32.mrf.mxu1  ;;  %v942_v26 = vadd.f32 %v941_v21, %v3410_v24 }
  0x9d   : > { %v1271_v27 = vadd.f32 %v1270_v23, %v3413_v25 }
  0x9e   : > { %2772 = vmatmul.msk.bf16.gmra.mxu0 %vm739_vm0, %v3033_v20  ;;  %v1590_v32 = vmax.f32 %v942_v26, 0.0 }
  0x9f   : > { %2836 = vmatmul.msk.bf16.gmra.mxu1 %vm739_vm0, %v3033_v20  ;;  %v1591_v34 = vmax.f32 %v1271_v27, 0.0 }
  0xa3   : > { %v943_v28 = vpop.f32.mrf.mxu0 }
  0xa4   : > { %v944_v29 = vadd.f32 %v943_v28, %v3410_v24  ;;  %v1272_v30 = vpop.f32.mrf.mxu1  ;;  %v3062_v28 = vld [vmem:[%s3380_s12 + $0x128] sm:$0xff] }
  0xa5   : > { %v1273_v31 = vadd.f32 %v1272_v30, %v3413_v25  ;;  %2865 = vmatmul.msk.bf16.gmra.mxu3 %vm739_vm0, %v3062_v28  ;;  %2801 = vmatmul.msk.bf16.gmra.mxu2 %vm739_vm0, %v3062_v28 }
  0xa6   : > { %v1592_v33 = vmax.f32 %v944_v29, 0.0 }
  0xa7   : > { %v1593_v35 = vmax.f32 %v1273_v31, 0.0  ;;  %v3037_v31 = vld [vmem:[%s3380_s12 + $0x60] sm:$0xff] }
  0xa8   : > { %v1847_v37 = vadd.f32 %v1592_v33, %v1590_v32 }
  0xa9   : > { %v1980_v38 = vadd.f32 %v1593_v35, %v1591_v34 }
  0xab   : > { %v946_v40 = vpop.f32.mrf.mxu0 }
  0xac   : > { %v947_v41 = vadd.f32 %v946_v40, %v3410_v24  ;;  %v1275_v42 = vpop.f32.mrf.mxu1 }
  0xad   : > { %v1276_v43 = vadd.f32 %v1275_v42, %v3413_v25 }
  0xae   : > { %v1594_v44 = vmax.f32 %v947_v41, 0.0  ;;  %2773 = vmatmul.msk.bf16.gmra.mxu0 %vm739_vm0, %v3034_v39 }
  0xaf   : > { %v1595_v45 = vmax.f32 %v1276_v43, 0.0  ;;  %2837 = vmatmul.msk.bf16.gmra.mxu1 %vm739_vm0, %v3034_v39 }
  0xb0   : > { %v1848_v46 = vadd.f32 %v1847_v37, %v1594_v44 }
  0xb1   : > { %v1981_v47 = vadd.f32 %v1980_v38, %v1595_v45 }
  0xb3   : > { %v948_v48 = vpop.f32.mrf.mxu0 }
  0xb4   : > { %v949_v49 = vadd.f32 %v948_v48, %v3410_v24  ;;  %v1277_v50 = vpop.f32.mrf.mxu1 }
  0xb5   : > { %v1278_v51 = vadd.f32 %v1277_v50, %v3413_v25 }
  0xb6   : > { %v1596_v52 = vmax.f32 %v949_v49, 0.0  ;;  %v3038_v49 = vld [vmem:[%s3380_s12 + $0x68] sm:$0xff] }
  0xb7   : > { %v1597_v53 = vmax.f32 %v1278_v51, 0.0 }
  0xb8   : > { %v1849_v55 = vadd.f32 %v1848_v46, %v1596_v52  ;;  %v3063_v46 = vld [vmem:[%s3380_s12 + $0x130] sm:$0xff] }
  0xb9   : > { %v1982_v56 = vadd.f32 %v1981_v47, %v1597_v53  ;;  %2866 = vmatmul.msk.bf16.gmra.mxu3 %vm739_vm0, %v3063_v46  ;;  %2802 = vmatmul.msk.bf16.gmra.mxu2 %vm739_vm0, %v3063_v46 }
  0xbb   : > { %v951_v58 = vpop.f32.mrf.mxu0 }
  0xbc   : > { %v952_v59 = vadd.f32 %v951_v58, %v3410_v24  ;;  %v1280_v60 = vpop.f32.mrf.mxu1 }
  0xbd   : > { %v1281_v61 = vadd.f32 %v1280_v60, %v3413_v25 }
  0xbe   : > { %v1598_v62 = vmax.f32 %v952_v59, 0.0  ;;  %2774 = vmatmul.msk.bf16.gmra.mxu0 %vm739_vm0, %v3035_v57 }
  0xbf   : > { %v1599_v63 = vmax.f32 %v1281_v61, 0.0  ;;  %2838 = vmatmul.msk.bf16.gmra.mxu1 %vm739_vm0, %v3035_v57 }
  0xc0   : > { %v1850_v0 = vadd.f32 %v1849_v55, %v1598_v62 }
  0xc1   : > { %v1983_v1 = vadd.f32 %v1982_v56, %v1599_v63 }
  0xc3   : > { %v953_v2 = vpop.f32.mrf.mxu0 }
  0xc4   : > { %v954_v3 = vadd.f32 %v953_v2, %v3410_v24  ;;  %v1282_v4 = vpop.f32.mrf.mxu1 }
  0xc5   : > { %v1283_v5 = vadd.f32 %v1282_v4, %v3413_v25 }
  0xc6   : > { %v1600_v6 = vmax.f32 %v954_v3, 0.0  ;;  %v3039_v3 = vld [vmem:[%s3380_s12 + $0x70] sm:$0xff] }
  0xc7   : > { %v1601_v7 = vmax.f32 %v1283_v5, 0.0 }
  0xc8   : > { %v1851_v9 = vadd.f32 %v1850_v0, %v1600_v6  ;;  %v3064_v0 = vld [vmem:[%s3380_s12 + $0x138] sm:$0xff] }
  0xc9   : > { %v1984_v10 = vadd.f32 %v1983_v1, %v1601_v7  ;;  %2867 = vmatmul.msk.bf16.gmra.mxu3 %vm739_vm0, %v3064_v0  ;;  %2803 = vmatmul.msk.bf16.gmra.mxu2 %vm739_vm0, %v3064_v0 }
  0xcb   : > { %v956_v12 = vpop.f32.mrf.mxu0 }
  0xcc   : > { %v957_v13 = vadd.f32 %v956_v12, %v3410_v24  ;;  %v1285_v14 = vpop.f32.mrf.mxu1 }
  0xcd   : > { %v1286_v15 = vadd.f32 %v1285_v14, %v3413_v25 }
  0xce   : > { %v1602_v16 = vmax.f32 %v957_v13, 0.0  ;;  %2775 = vmatmul.msk.bf16.gmra.mxu0 %vm739_vm0, %v3036_v11 }
  0xcf   : > { %v1603_v17 = vmax.f32 %v1286_v15, 0.0  ;;  %2839 = vmatmul.msk.bf16.gmra.mxu1 %vm739_vm0, %v3036_v11 }
  0xd0   : > { %v1852_v18 = vadd.f32 %v1851_v9, %v1602_v16 }
  0xd1   : > { %v1985_v19 = vadd.f32 %v1984_v10, %v1603_v17 }
  0xd3   : > { %v958_v20 = vpop.f32.mrf.mxu0 }
  0xd4   : > { %v959_v21 = vadd.f32 %v958_v20, %v3410_v24  ;;  %v1287_v22 = vpop.f32.mrf.mxu1 }
  0xd5   : > { %v1288_v23 = vadd.f32 %v1287_v22, %v3413_v25 }
  0xd6   : > { %v1604_v26 = vmax.f32 %v959_v21, 0.0  ;;  %v3040_v21 = vld [vmem:[%s3380_s12 + $0x78] sm:$0xff] }
  0xd7   : > { %v1605_v27 = vmax.f32 %v1288_v23, 0.0 }
  0xd8   : > { %v1853_v29 = vadd.f32 %v1852_v18, %v1604_v26  ;;  %v3065_v18 = vld [vmem:[%s3380_s12 + $0x140] sm:$0xff] }
  0xd9   : > { %v1986_v30 = vadd.f32 %v1985_v19, %v1605_v27  ;;  %2868 = vmatmul.msk.bf16.gmra.mxu3 %vm739_vm0, %v3065_v18  ;;  %2804 = vmatmul.msk.bf16.gmra.mxu2 %vm739_vm0, %v3065_v18 }
  0xdb   : > { %v961_v32 = vpop.f32.mrf.mxu0 }
  0xdc   : > { %v962_v33 = vadd.f32 %v961_v32, %v3410_v24  ;;  %v1290_v34 = vpop.f32.mrf.mxu1 }
  0xdd   : > { %v1291_v35 = vadd.f32 %v1290_v34, %v3413_v25 }
  0xde   : > { %v1606_v36 = vmax.f32 %v962_v33, 0.0  ;;  %2776 = vmatmul.msk.bf16.gmra.mxu0 %vm739_vm0, %v3037_v31 }
  0xdf   : > { %v1607_v37 = vmax.f32 %v1291_v35, 0.0  ;;  %2840 = vmatmul.msk.bf16.gmra.mxu1 %vm739_vm0, %v3037_v31 }
  0xe0   : > { %v1854_v38 = vadd.f32 %v1853_v29, %v1606_v36 }
  0xe1   : > { %v1987_v39 = vadd.f32 %v1986_v30, %v1607_v37 }
  0xe3   : > { %v963_v40 = vpop.f32.mrf.mxu0 }
  0xe4   : > { %v964_v41 = vadd.f32 %v963_v40, %v3410_v24  ;;  %v1292_v42 = vpop.f32.mrf.mxu1 }
  0xe5   : > { %v1293_v43 = vadd.f32 %v1292_v42, %v3413_v25 }
  0xe6   : > { %v1608_v44 = vmax.f32 %v964_v41, 0.0  ;;  %v3041_v41 = vld [vmem:[%s3380_s12 + $0x80] sm:$0xff] }
  0xe7   : > { %v1609_v45 = vmax.f32 %v1293_v43, 0.0 }
  0xe8   : > { %v1855_v47 = vadd.f32 %v1854_v38, %v1608_v44  ;;  %v3066_v38 = vld [vmem:[%s3380_s12 + $0x148] sm:$0xff] }
  0xe9   : > { %v1988_v48 = vadd.f32 %v1987_v39, %v1609_v45  ;;  %2869 = vmatmul.msk.bf16.gmra.mxu3 %vm739_vm0, %v3066_v38  ;;  %2805 = vmatmul.msk.bf16.gmra.mxu2 %vm739_vm0, %v3066_v38  ;;  %v3069_v38 = vld [vmem:[%s3380_s12 + $0x160] sm:$0xff] }
  0xeb   : > { %v966_v50 = vpop.f32.mrf.mxu0 }
  0xec   : > { %v967_v51 = vadd.f32 %v966_v50, %v3410_v24  ;;  %v1295_v52 = vpop.f32.mrf.mxu1 }
  0xed   : > { %v1296_v53 = vadd.f32 %v1295_v52, %v3413_v25 }
  0xee   : > { %v1610_v54 = vmax.f32 %v967_v51, 0.0  ;;  %2777 = vmatmul.msk.bf16.gmra.mxu0 %vm739_vm0, %v3038_v49 }
  0xef   : > { %v1611_v55 = vmax.f32 %v1296_v53, 0.0  ;;  %2841 = vmatmul.msk.bf16.gmra.mxu1 %vm739_vm0, %v3038_v49 }
  0xf0   : > { %v1856_v56 = vadd.f32 %v1855_v47, %v1610_v54 }
  0xf1   : > { %v1989_v57 = vadd.f32 %v1988_v48, %v1611_v55 }
  0xf3   : > { %v968_v58 = vpop.f32.mrf.mxu0 }
  0xf4   : > { %v969_v59 = vadd.f32 %v968_v58, %v3410_v24  ;;  %v1297_v60 = vpop.f32.mrf.mxu1 }
  0xf5   : > { %v1298_v61 = vadd.f32 %v1297_v60, %v3413_v25 }
  0xf6   : > { %v1612_v62 = vmax.f32 %v969_v59, 0.0  ;;  %v3042_v59 = vld [vmem:[%s3380_s12 + $0x88] sm:$0xff] }
  0xf7   : > { %v1613_v63 = vmax.f32 %v1298_v61, 0.0 }
  0xf8   : > { %v1857_v1 = vadd.f32 %v1856_v56, %v1612_v62  ;;  %v3067_v56 = vld [vmem:[%s3380_s12 + $0x150] sm:$0xff] }
  0xf9   : > { %v1990_v2 = vadd.f32 %v1989_v57, %v1613_v63  ;;  %2870 = vmatmul.msk.bf16.gmra.mxu3 %vm739_vm0, %v3067_v56  ;;  %2806 = vmatmul.msk.bf16.gmra.mxu2 %vm739_vm0, %v3067_v56  ;;  %v3505_v63 = vpop.f32.mrf.mxu3 }
  0xfb   : > { %v971_v4 = vpop.f32.mrf.mxu0 }
  0xfc   : > { %v972_v5 = vadd.f32 %v971_v4, %v3410_v24  ;;  %v1300_v6 = vpop.f32.mrf.mxu1 }
  0xfd   : > { %v1301_v7 = vadd.f32 %v1300_v6, %v3413_v25 }
  0xfe   : > { %v1614_v8 = vmax.f32 %v972_v5, 0.0  ;;  %2778 = vmatmul.msk.bf16.gmra.mxu0 %vm739_vm0, %v3039_v3 }
  0xff   : > { %v1615_v9 = vmax.f32 %v1301_v7, 0.0  ;;  %2842 = vmatmul.msk.bf16.gmra.mxu1 %vm739_vm0, %v3039_v3 }
 0x100   : > { %v1858_v10 = vadd.f32 %v1857_v1, %v1614_v8 }
 0x101   : > { %v1991_v11 = vadd.f32 %v1990_v2, %v1615_v9  ;;  %v3509_v2 = vpop.f32.mrf.mxu2  ;;  %v3513_v9 = vpop.f32.mrf.mxu3 }
 0x103   : > { %v973_v12 = vpop.f32.mrf.mxu0 }
 0x104   : > { %v974_v13 = vadd.f32 %v973_v12, %v3410_v24  ;;  %v1302_v14 = vpop.f32.mrf.mxu1 }
 0x105   : > { %v1303_v15 = vadd.f32 %v1302_v14, %v3413_v25  ;;  %v3068_v14 = vld [vmem:[%s3380_s12 + $0x158] sm:$0xff] }
 0x106   : > { %v1616_v16 = vmax.f32 %v974_v13, 0.0 }
 0x107   : > { %v1617_v17 = vmax.f32 %v1303_v15, 0.0 }
 0x108   : > { %v1859_v19 = vadd.f32 %v1858_v10, %v1616_v16 }
 0x109   : > { %v1992_v20 = vadd.f32 %v1991_v11, %v1617_v17  ;;  %v3516_v12 = vpop.f32.mrf.mxu2  ;;  %2871 = vmatmul.msk.bf16.gmra.mxu3 %vm739_vm0, %v3068_v14  ;;  %2807 = vmatmul.msk.bf16.gmra.mxu2 %vm739_vm0, %v3068_v14  ;;  %v3043_v17 = vld [vmem:[%s3380_s12 + $0x90] sm:$0xff] }
 0x10b   : > { %v976_v22 = vpop.f32.mrf.mxu0 }
 0x10c   : > { %v977_v23 = vadd.f32 %v976_v22, %v3410_v24  ;;  %v1305_v26 = vpop.f32.mrf.mxu1 }
 0x10d   : > { %v1306_v27 = vadd.f32 %v1305_v26, %v3413_v25 }
 0x10e   : > { %v1618_v28 = vmax.f32 %v977_v23, 0.0  ;;  %2779 = vmatmul.msk.bf16.gmra.mxu0 %vm739_vm0, %v3040_v21 }
 0x10f   : > { %v1619_v29 = vmax.f32 %v1306_v27, 0.0  ;;  %2843 = vmatmul.msk.bf16.gmra.mxu1 %vm739_vm0, %v3040_v21  ;;  %v3523_v21 = vpop.f32.mrf.mxu3 }
 0x110   : > { %v1860_v30 = vadd.f32 %v1859_v19, %v1618_v28 }
 0x111   : > { %v1993_v31 = vadd.f32 %v1992_v20, %v1619_v29  ;;  %v3527_v26 = vpop.f32.mrf.mxu2 }
 0x113   : > { %v978_v32 = vpop.f32.mrf.mxu0 }
 0x114   : > { %v979_v33 = vadd.f32 %v978_v32, %v3410_v24  ;;  %v1307_v34 = vpop.f32.mrf.mxu1 }
 0x115   : > { %v1308_v35 = vadd.f32 %v1307_v34, %v3413_v25 }
 0x116   : > { %v1620_v36 = vmax.f32 %v979_v33, 0.0 }
 0x117   : > { %v1621_v37 = vmax.f32 %v1308_v35, 0.0  ;;  %v3531_v33 = vpop.f32.mrf.mxu3 }
 0x118   : > { %v1861_v39 = vadd.f32 %v1860_v30, %v1620_v36 }
 0x119   : > { %v1994_v40 = vadd.f32 %v1993_v31, %v1621_v37  ;;  %v3534_v36 = vpop.f32.mrf.mxu2  ;;  %2872 = vmatmul.msk.bf16.gmra.mxu3 %vm739_vm0, %v3069_v38  ;;  %2808 = vmatmul.msk.bf16.gmra.mxu2 %vm739_vm0, %v3069_v38 }
 0x11b   : > { %v981_v42 = vpop.f32.mrf.mxu0 }
 0x11c   : > { %v982_v43 = vadd.f32 %v981_v42, %v3410_v24  ;;  %v1310_v44 = vpop.f32.mrf.mxu1 }
 0x11d   : > { %v1311_v45 = vadd.f32 %v1310_v44, %v3413_v25 }
 0x11e   : > { %v1622_v46 = vmax.f32 %v982_v43, 0.0  ;;  %2780 = vmatmul.msk.bf16.gmra.mxu0 %vm739_vm0, %v3041_v41 }
 0x11f   : > { %v1623_v47 = vmax.f32 %v1311_v45, 0.0  ;;  %2844 = vmatmul.msk.bf16.gmra.mxu1 %vm739_vm0, %v3041_v41  ;;  %v3044_v41 = vld [vmem:[%s3380_s12 + $0x98] sm:$0xff]  ;;  %v3541_v45 = vpop.f32.mrf.mxu3 }
 0x120   : > { %v1862_v48 = vadd.f32 %v1861_v39, %v1622_v46 }
 0x121   : > { %v1995_v49 = vadd.f32 %v1994_v40, %v1623_v47 }
 0x123   : > { %v983_v50 = vpop.f32.mrf.mxu0 }
 0x124   : > { %v984_v51 = vadd.f32 %v983_v50, %v3410_v24  ;;  %v1312_v52 = vpop.f32.mrf.mxu1 }
 0x125   : > { %v1313_v53 = vadd.f32 %v1312_v52, %v3413_v25  ;;  %v2950_v52 = vld [vmem:[%s4432_s3 + $0x70] sm:$0xf] }
 0x126   : > { %v1624_v54 = vmax.f32 %v984_v51, 0.0 }
 0x127   : > { %v1625_v55 = vmax.f32 %v1313_v53, 0.0  ;;  %v3108_v53 = vld [vmem:[%s4432_s3 + $0x74] sm:$0xf0] }
 0x128   : > { %v1863_v57 = vadd.f32 %v1862_v48, %v1624_v54  ;;  %v3545_v48 = vpop.f32.mrf.mxu2  ;;  %v2951_v54 = vor.u32 %v3108_v53, %v2950_v52 }
 0x129   : > { %v1996_v58 = vadd.f32 %v1995_v49, %v1625_v55 }
 0x12a   : > { %2335 = vmatpush.bf16.msrb.mxu2 %v2951_v54 }
 0x12b   : > { %v986_v60 = vpop.f32.mrf.mxu0 }
 0x12c   : > { %v987_v61 = vadd.f32 %v986_v60, %v3410_v24  ;;  %v1315_v62 = vpop.f32.mrf.mxu1 }
 0x12d   : > { %v1316_v0 = vadd.f32 %v1315_v62, %v3413_v25 }
 0x12e   : > { %v1626_v1 = vmax.f32 %v987_v61, 0.0  ;;  %2781 = vmatmul.msk.bf16.gmra.mxu0 %vm739_vm0, %v3042_v59 }
 0x12f   : > { %v1627_v3 = vmax.f32 %v1316_v0, 0.0  ;;  %2845 = vmatmul.msk.bf16.gmra.mxu1 %vm739_vm0, %v3042_v59  ;;  %v3070_v0 = vld [vmem:[%s3380_s12 + $0x168] sm:$0xff] }
 0x130   : > { %v1864_v4 = vadd.f32 %v1863_v57, %v1626_v1  ;;  %v3558_v61 = vpop.f32.mrf.mxu2  ;;  %2873 = vmatmul.msk.bf16.gmra.mxu3 %vm739_vm0, %v3070_v0  ;;  %2809 = vmatmul.msk.bf16.gmra.mxu2 %vm739_vm0, %v3070_v0  ;;  %v3047_v0 = vld [vmem:[%s3380_s12 + $0xb0] sm:$0xff] }
 0x131   : > { %v1997_v5 = vadd.f32 %v1996_v58, %v1627_v3  ;;  %v3555_v58 = vpop.f32.mrf.mxu3 }
 0x133   : > { %v988_v6 = vpop.f32.mrf.mxu0 }
 0x134   : > { %v989_v7 = vadd.f32 %v988_v6, %v3410_v24  ;;  %v1317_v8 = vpop.f32.mrf.mxu1  ;;  %v3045_v6 = vld [vmem:[%s3380_s12 + $0xa0] sm:$0xff] }
 0x135   : > { %v1318_v10 = vadd.f32 %v1317_v8, %v3413_v25 }
 0x136   : > { %v1628_v11 = vmax.f32 %v989_v7, 0.0 }
 0x137   : > { %v1629_v13 = vmax.f32 %v1318_v10, 0.0 }
 0x138   : > { %v1865_v15 = vadd.f32 %v1864_v4, %v1628_v11  ;;  %v3014_v4 = vld [vmem:[%s4432_s3 + $0xf0] sm:$0xf] }
 0x139   : > { %v1998_v16 = vadd.f32 %v1997_v5, %v1629_v13  ;;  %v3124_v5 = vld [vmem:[%s4432_s3 + $0xf4] sm:$0xf0]  ;;  %v3571_v13 = vpop.f32.mrf.mxu3 }
 0x13a   : > { %v3015_v7 = vor.u32 %v3124_v5, %v3014_v4 }
 0x13b   : > { %v991_v18 = vpop.f32.mrf.mxu0 }
 0x13c   : > { %v992_v19 = vadd.f32 %v991_v18, %v3410_v24  ;;  %v1320_v20 = vpop.f32.mrf.mxu1  ;;  %2348 = vmatpush.bf16.msrb.mxu3 %v3015_v7 }
 0x13d   : > { %v1321_v22 = vadd.f32 %v1320_v20, %v3413_v25 }
 0x13e   : > { %v1630_v23 = vmax.f32 %v992_v19, 0.0  ;;  %2782 = vmatmul.msk.bf16.gmra.mxu0 %vm739_vm0, %v3043_v17 }
 0x13f   : > { %v1631_v27 = vmax.f32 %v1321_v22, 0.0  ;;  %2846 = vmatmul.msk.bf16.gmra.mxu1 %vm739_vm0, %v3043_v17 }
 0x140   : > { %v1866_v28 = vadd.f32 %v1865_v15, %v1630_v23 }
 0x141   : > { %v1999_v29 = vadd.f32 %v1998_v16, %v1631_v27  ;;  %v3575_v16 = vpop.f32.mrf.mxu2  ;;  %v3579_v27 = vpop.f32.mrf.mxu3 }
 0x143   : > { %v993_v30 = vpop.f32.mrf.mxu0 }
 0x144   : > { %v994_v31 = vadd.f32 %v993_v30, %v3410_v24  ;;  %v1322_v32 = vpop.f32.mrf.mxu1 }
 0x145   : > { %v1323_v34 = vadd.f32 %v1322_v32, %v3413_v25  ;;  %v3071_v32 = vld [vmem:[%s3380_s12 + $0x170] sm:$0xff] }
 0x146   : > { %v1632_v35 = vmax.f32 %v994_v31, 0.0  ;;  %2874 = vmatmul.msk.bf16.gmra.mxu3 %vm739_vm0, %v3071_v32  ;;  %2810 = vmatmul.msk.bf16.gmra.mxu2 %vm739_vm0, %v3071_v32 }
 0x147   : > { %v1633_v37 = vmax.f32 %v1323_v34, 0.0 }
 0x148   : > { %v1867_v39 = vadd.f32 %v1866_v28, %v1632_v35 }
 0x149   : > { %v2000_v40 = vadd.f32 %v1999_v29, %v1633_v37  ;;  %v3582_v30 = vpop.f32.mrf.mxu2  ;;  %v3046_v37 = vld [vmem:[%s3380_s12 + $0xa8] sm:$0xff] }
 0x14b   : > { %v996_v42 = vpop.f32.mrf.mxu0 }
 0x14c   : > { %v997_v43 = vadd.f32 %v996_v42, %v3410_v24  ;;  %v1325_v44 = vpop.f32.mrf.mxu1 }
 0x14d   : > { %v1326_v46 = vadd.f32 %v1325_v44, %v3413_v25 }
 0x14e   : > { %v1634_v47 = vmax.f32 %v997_v43, 0.0  ;;  %2783 = vmatmul.msk.bf16.gmra.mxu0 %vm739_vm0, %v3044_v41 }
 0x14f   : > { %v1635_v49 = vmax.f32 %v1326_v46, 0.0  ;;  %2847 = vmatmul.msk.bf16.gmra.mxu1 %vm739_vm0, %v3044_v41  ;;  %v3589_v41 = vpop.f32.mrf.mxu3 }
 0x150   : > { %v1868_v50 = vadd.f32 %v1867_v39, %v1634_v47 }
 0x151   : > { %v2001_v51 = vadd.f32 %v2000_v40, %v1635_v49  ;;  %v3593_v44 = vpop.f32.mrf.mxu2 }
 0x153   : > { %v998_v55 = vpop.f32.mrf.mxu0 }
 0x154   : > { %v999_v56 = vadd.f32 %v998_v55, %v3410_v24  ;;  %v1327_v57 = vpop.f32.mrf.mxu1 }
 0x155   : > { %v1328_v59 = vadd.f32 %v1327_v57, %v3413_v25 }
 0x156   : > { %v1636_v60 = vmax.f32 %v999_v56, 0.0 }
 0x157   : > { %v1637_v62 = vmax.f32 %v1328_v59, 0.0  ;;  %v3597_v53 = vpop.f32.mrf.mxu3  ;;  %v3072_v59 = vld [vmem:[%s3380_s12 + $0x178] sm:$0xff] }
 0x158   : > { %v1869_v1 = vadd.f32 %v1868_v50, %v1636_v60  ;;  %2875 = vmatmul.msk.bf16.gmra.mxu3 %vm739_vm0, %v3072_v59  ;;  %2811 = vmatmul.msk.bf16.gmra.mxu2 %vm739_vm0, %v3072_v59 }
 0x159   : > { %v2002_v3 = vadd.f32 %v2001_v51, %v1637_v62  ;;  %v3600_v56 = vpop.f32.mrf.mxu2 }
 0x15b   : > { %v1001_v8 = vpop.f32.mrf.mxu0 }
 0x15c   : > { %v1002_v10 = vadd.f32 %v1001_v8, %v3410_v24  ;;  %v1330_v11 = vpop.f32.mrf.mxu1 }
 0x15d   : > { %v1331_v14 = vadd.f32 %v1330_v11, %v3413_v25 }
 0x15e   : > { %v1638_v15 = vmax.f32 %v1002_v10, 0.0  ;;  %2784 = vmatmul.msk.bf16.gmra.mxu0 %vm739_vm0, %v3045_v6 }
 0x15f   : > { %v1639_v17 = vmax.f32 %v1331_v14, 0.0  ;;  %2848 = vmatmul.msk.bf16.gmra.mxu1 %vm739_vm0, %v3045_v6  ;;  %v3607_v5 = vpop.f32.mrf.mxu3 }
 0x160   : > { %v1870_v18 = vadd.f32 %v1869_v1, %v1638_v15 }
 0x161   : > { %v2003_v19 = vadd.f32 %v2002_v3, %v1639_v17  ;;  %v3611_v8 = vpop.f32.mrf.mxu2 }
 0x163   : > { %v1003_v20 = vpop.f32.mrf.mxu0 }
 0x164   : > { %v1004_v22 = vadd.f32 %v1003_v20, %v3410_v24  ;;  %v1332_v23 = vpop.f32.mrf.mxu1 }
 0x165   : > { %v1333_v28 = vadd.f32 %v1332_v23, %v3413_v25 }
 0x166   : > { %v1640_v29 = vmax.f32 %v1004_v22, 0.0 }
 0x167   : > { %v1641_v31 = vmax.f32 %v1333_v28, 0.0 }
 0x168   : > { %v1871_v34 = vadd.f32 %v1870_v18, %v1640_v29  ;;  %v3073_v29 = vld [vmem:[%s3380_s12 + $0x180] sm:$0xff] }
 0x169   : > { %v2004_v35 = vadd.f32 %v2003_v19, %v1641_v31  ;;  %v3615_v19 = vpop.f32.mrf.mxu3  ;;  %v3618_v23 = vpop.f32.mrf.mxu2  ;;  %2876 = vmatmul.msk.bf16.gmra.mxu3 %vm739_vm0, %v3073_v29  ;;  %2812 = vmatmul.msk.bf16.gmra.mxu2 %vm739_vm0, %v3073_v29 }
 0x16b   : > { %v1006_v38 = vpop.f32.mrf.mxu0 }
 0x16c   : > { %v1007_v39 = vadd.f32 %v1006_v38, %v3410_v24  ;;  %v1335_v40 = vpop.f32.mrf.mxu1 }
 0x16d   : > { %v1336_v42 = vadd.f32 %v1335_v40, %v3413_v25 }
 0x16e   : > { %v1642_v43 = vmax.f32 %v1007_v39, 0.0  ;;  %2785 = vmatmul.msk.bf16.gmra.mxu0 %vm739_vm0, %v3046_v37 }
 0x16f   : > { %v1643_v46 = vmax.f32 %v1336_v42, 0.0  ;;  %2849 = vmatmul.msk.bf16.gmra.mxu1 %vm739_vm0, %v3046_v37 }
 0x170   : > { %v1872_v47 = vadd.f32 %v1871_v34, %v1642_v43  ;;  %v3048_v34 = vld [vmem:[%s3380_s12 + $0xb8] sm:$0xff] }
 0x171   : > { %v2005_v49 = vadd.f32 %v2004_v35, %v1643_v46  ;;  %v3625_v39 = vpop.f32.mrf.mxu3  ;;  %v3629_v43 = vpop.f32.mrf.mxu2 }
 0x173   : > { %v1008_v50 = vpop.f32.mrf.mxu0 }
 0x174   : > { %v1009_v51 = vadd.f32 %v1008_v50, %v3410_v24  ;;  %v1337_v52 = vpop.f32.mrf.mxu1  ;;  %v2942_v50 = vld [vmem:[%s4432_s3 + $0x60] sm:$0xf] }
 0x175   : > { %v1338_v54 = vadd.f32 %v1337_v52, %v3413_v25  ;;  %v3006_v52 = vld [vmem:[%s4432_s3 + $0xe0] sm:$0xf] }
 0x176   : > { %v1644_v55 = vmax.f32 %v1009_v51, 0.0  ;;  %v3106_v51 = vld [vmem:[%s4432_s3 + $0x64] sm:$0xf0] }
 0x177   : > { %v1645_v57 = vmax.f32 %v1338_v54, 0.0  ;;  %v2943_v54 = vor.u32 %v3106_v51, %v2942_v50  ;;  %v3075_v50 = vld [vmem:[%s3380_s12 + $0x190] sm:$0xff] }
 0x178   : > { %v1873_v60 = vadd.f32 %v1872_v47, %v1644_v55  ;;  %v3122_v55 = vld [vmem:[%s4432_s3 + $0xe4] sm:$0xf0] }
 0x179   : > { %v2006_v62 = vadd.f32 %v2005_v49, %v1645_v57  ;;  %v3007_v59 = vor.u32 %v3122_v55, %v3006_v52  ;;  %2336 = vmatpush.bf16.msrb.mxu2 %v2943_v54  ;;  %v3050_v54 = vld [vmem:[%s3380_s12 + $0xc8] sm:$0xff] }
 0x17b   : > { %v1011_v1 = vpop.f32.mrf.mxu0  ;;  %2349 = vmatpush.bf16.msrb.mxu3 %v3007_v59 }
 0x17c   : > { %v1012_v3 = vadd.f32 %v1011_v1, %v3410_v24  ;;  %v1340_v4 = vpop.f32.mrf.mxu1 }
 0x17d   : > { %v1341_v6 = vadd.f32 %v1340_v4, %v3413_v25  ;;  %v3648_v4 = vpop.f32.mrf.mxu2 }
 0x17e   : > { %v1646_v7 = vmax.f32 %v1012_v3, 0.0  ;;  %2786 = vmatmul.msk.bf16.gmra.mxu0 %vm739_vm0, %v3047_v0 }
 0x17f   : > { %v1647_v10 = vmax.f32 %v1341_v6, 0.0  ;;  %2850 = vmatmul.msk.bf16.gmra.mxu1 %vm739_vm0, %v3047_v0  ;;  %v3645_v0 = vpop.f32.mrf.mxu3 }
 0x180   : > { %v1874_v11 = vadd.f32 %v1873_v60, %v1646_v7  ;;  %v3074_v7 = vld [vmem:[%s3380_s12 + $0x188] sm:$0xff] }
 0x181   : > { %v2007_v14 = vadd.f32 %v2006_v62, %v1647_v10  ;;  %2877 = vmatmul.msk.bf16.gmra.mxu3 %vm739_vm0, %v3074_v7  ;;  %2813 = vmatmul.msk.bf16.gmra.mxu2 %vm739_vm0, %v3074_v7 }
 0x183   : > { %v1013_v15 = vpop.f32.mrf.mxu0 }
 0x184   : > { %v1014_v17 = vadd.f32 %v1013_v15, %v3410_v24  ;;  %v1342_v18 = vpop.f32.mrf.mxu1 }
 0x185   : > { %v1343_v20 = vadd.f32 %v1342_v18, %v3413_v25  ;;  %v3659_v29 = vpop.f32.mrf.mxu2 }
 0x186   : > { %v1648_v22 = vmax.f32 %v1014_v17, 0.0 }
 0x187   : > { %v1649_v28 = vmax.f32 %v1343_v20, 0.0  ;;  %v3655_v20 = vpop.f32.mrf.mxu3 }
 0x188   : > { %v1875_v31 = vadd.f32 %v1874_v11, %v1648_v22  ;;  %4437 = vst [vmem:[#allocation6_spill] sm:$0xff] %v3655_v20 }
 0x189   : > { %v2008_v32 = vadd.f32 %v2007_v14, %v1649_v28  ;;  %v3049_v14 = vld [vmem:[%s3380_s12 + $0xc0] sm:$0xff] }
 0x18b   : > { %v1016_v35 = vpop.f32.mrf.mxu0 }
 0x18c   : > { %v1017_v37 = vadd.f32 %v1016_v35, %v3410_v24  ;;  %v1345_v38 = vpop.f32.mrf.mxu1 }
 0x18d   : > { %v1346_v40 = vadd.f32 %v1345_v38, %v3413_v25 }
 0x18e   : > { %v1650_v42 = vmax.f32 %v1017_v37, 0.0  ;;  %2787 = vmatmul.msk.bf16.gmra.mxu0 %vm739_vm0, %v3048_v34 }
 0x18f   : > { %v1651_v46 = vmax.f32 %v1346_v40, 0.0  ;;  %2851 = vmatmul.msk.bf16.gmra.mxu1 %vm739_vm0, %v3048_v34  ;;  %v3663_v40 = vpop.f32.mrf.mxu3 }
 0x190   : > { %v1876_v47 = vadd.f32 %v1875_v31, %v1650_v42  ;;  %4438 = vst [vmem:[#allocation7_spill] sm:$0xff] %v3663_v40 }
 0x191   : > { %v2009_v49 = vadd.f32 %v2008_v32, %v1651_v46  ;;  %2878 = vmatmul.msk.bf16.gmra.mxu3 %vm739_vm0, %v3075_v50  ;;  %2814 = vmatmul.msk.bf16.gmra.mxu2 %vm739_vm0, %v3075_v50 }
 0x193   : > { %v1018_v57 = vpop.f32.mrf.mxu0 }
 0x194   : > { %v1019_v60 = vadd.f32 %v1018_v57, %v3410_v24  ;;  %v1347_v62 = vpop.f32.mrf.mxu1 }
 0x195   : > { %v1348_v1 = vadd.f32 %v1347_v62, %v3413_v25 }
 0x196   : > { %v1652_v3 = vmax.f32 %v1019_v60, 0.0 }
 0x197   : > { %v1653_v6 = vmax.f32 %v1348_v1, 0.0  ;;  %v3673_v60 = vpop.f32.mrf.mxu3 }
 0x198   : > { %v1877_v10 = vadd.f32 %v1876_v47, %v1652_v3  ;;  %v3666_v47 = vpop.f32.mrf.mxu2  ;;  %4440 = vst [vmem:[#allocation9_spill] sm:$0xff] %v3673_v60 }
 0x199   : > { %v2010_v11 = vadd.f32 %v2009_v49, %v1653_v6  ;;  %4439 = vst [vmem:[#allocation8_spill] sm:$0xff] %v3666_v47 }
 0x19b   : > { %v1021_v15 = vpop.f32.mrf.mxu0 }
 0x19c   : > { %v1022_v17 = vadd.f32 %v1021_v15, %v3410_v24  ;;  %v1350_v18 = vpop.f32.mrf.mxu1 }
 0x19d   : > { %v1351_v22 = vadd.f32 %v1350_v18, %v3413_v25 }
 0x19e   : > { %v1654_v28 = vmax.f32 %v1022_v17, 0.0  ;;  %2788 = vmatmul.msk.bf16.gmra.mxu0 %vm739_vm0, %v3049_v14 }
 0x19f   : > { %v1655_v31 = vmax.f32 %v1351_v22, 0.0  ;;  %2852 = vmatmul.msk.bf16.gmra.mxu1 %vm739_vm0, %v3049_v14  ;;  %v3681_v17 = vpop.f32.mrf.mxu3 }
 0x1a0   : > { %v1878_v32 = vadd.f32 %v1877_v10, %v1654_v28  ;;  %v3677_v3 = vpop.f32.mrf.mxu2  ;;  %4442 = vst [vmem:[#allocation11_spill] sm:$0xff] %v3681_v17 }
 0x1a1   : > { %v2011_v34 = vadd.f32 %v2010_v11, %v1655_v31  ;;  %4441 = vst [vmem:[#allocation10_spill] sm:$0xff] %v3677_v3 }
 0x1a3   : > { %v1023_v35 = vpop.f32.mrf.mxu0 }
 0x1a4   : > { %v1024_v37 = vadd.f32 %v1023_v35, %v3410_v24  ;;  %v1352_v38 = vpop.f32.mrf.mxu1 }
 0x1a5   : > { %v1353_v42 = vadd.f32 %v1352_v38, %v3413_v25 }
 0x1a6   : > { %v1656_v46 = vmax.f32 %v1024_v37, 0.0  ;;  %v3051_v37 = vld [vmem:[%s3380_s12 + $0xd0] sm:$0xff] }
 0x1a7   : > { %v1657_v49 = vmax.f32 %v1353_v42, 0.0 }
 0x1a8   : > { %v1879_v51 = vadd.f32 %v1878_v32, %v1656_v46  ;;  %v3684_v28 = vpop.f32.mrf.mxu2  ;;  %v3076_v32 = vld [vmem:[%s3380_s12 + $0x198] sm:$0xff] }
 0x1a9   : > { %v2012_v52 = vadd.f32 %v2011_v34, %v1657_v49  ;;  %4443 = vst [vmem:[#allocation12_spill] sm:$0xff] %v3684_v28  ;;  %2879 = vmatmul.msk.bf16.gmra.mxu3 %vm739_vm0, %v3076_v32  ;;  %2815 = vmatmul.msk.bf16.gmra.mxu2 %vm739_vm0, %v3076_v32  ;;  %v3691_v49 = vpop.f32.mrf.mxu3  ;;  %v3104_v32 = vld [vmem:[%s4432_s3 + $0x54] sm:$0xf0] }
 0x1aa   : > { %4444 = vst [vmem:[#allocation13_spill] sm:$0xff] %v3691_v49 }
 0x1ab   : > { %v1026_v55 = vpop.f32.mrf.mxu0 }
 0x1ac   : > { %v1027_v57 = vadd.f32 %v1026_v55, %v3410_v24  ;;  %v1355_v59 = vpop.f32.mrf.mxu1 }
 0x1ad   : > { %v1356_v62 = vadd.f32 %v1355_v59, %v3413_v25 }
 0x1ae   : > { %v1658_v1 = vmax.f32 %v1027_v57, 0.0  ;;  %2789 = vmatmul.msk.bf16.gmra.mxu0 %vm739_vm0, %v3050_v54 }
 0x1af   : > { %v1659_v6 = vmax.f32 %v1356_v62, 0.0  ;;  %2853 = vmatmul.msk.bf16.gmra.mxu1 %vm739_vm0, %v3050_v54 }
 0x1b0   : > { %v1880_v7 = vadd.f32 %v1879_v51, %v1658_v1 }
 0x1b1   : > { %v2013_v10 = vadd.f32 %v2012_v52, %v1659_v6  ;;  %v3695_v52 = vpop.f32.mrf.mxu2  ;;  %v3699_v6 = vpop.f32.mrf.mxu3 }
 0x1b2   : > { %4445 = vst [vmem:[#allocation14_spill] sm:$0xff] %v3695_v52 }
 0x1b3   : > { %v1028_v11 = vpop.f32.mrf.mxu0  ;;  %4446 = vst [vmem:[#allocation15_spill] sm:$0xff] %v3699_v6 }
 0x1b4   : > { %v1029_v14 = vadd.f32 %v1028_v11, %v3410_v24  ;;  %v1357_v15 = vpop.f32.mrf.mxu1 }
 0x1b5   : > { %v1358_v18 = vadd.f32 %v1357_v15, %v3413_v25  ;;  %v3077_v15 = vld [vmem:[%s3380_s12 + $0x1a0] sm:$0xff] }
 0x1b6   : > { %v1660_v22 = vmax.f32 %v1029_v14, 0.0 }
 0x1b7   : > { %v1661_v31 = vmax.f32 %v1358_v18, 0.0 }
 0x1b8   : > { %v1881_v34 = vadd.f32 %v1880_v7, %v1660_v22 }
 0x1b9   : > { %v2014_v35 = vadd.f32 %v2013_v10, %v1661_v31  ;;  %v3702_v11 = vpop.f32.mrf.mxu2  ;;  %2880 = vmatmul.msk.bf16.gmra.mxu3 %vm739_vm0, %v3077_v15  ;;  %v2934_v31 = vld [vmem:[%s4432_s3 + $0x50] sm:$0xf]  ;;  %2816 = vmatmul.msk.bf16.gmra.mxu2 %vm739_vm0, %v3077_v15 }
 0x1ba   : > { %4447 = vst [vmem:[#allocation16_spill] sm:$0xff] %v3702_v11 }
 0x1bb   : > { %v1031_v38 = vpop.f32.mrf.mxu0 }
 0x1bc   : > { %v1032_v42 = vadd.f32 %v1031_v38, %v3410_v24  ;;  %v1360_v46 = vpop.f32.mrf.mxu1 }
 0x1bd   : > { %v1361_v50 = vadd.f32 %v1360_v46, %v3413_v25  ;;  %v3715_v46 = vpop.f32.mrf.mxu3 }
 0x1be   : > { %v1662_v51 = vmax.f32 %v1032_v42, 0.0  ;;  %2790 = vmatmul.msk.bf16.gmra.mxu0 %vm739_vm0, %v3051_v37  ;;  %4448 = vst [vmem:[#allocation17_spill] sm:$0xff] %v3715_v46 }
 0x1bf   : > { %v1663_v54 = vmax.f32 %v1361_v50, 0.0  ;;  %2854 = vmatmul.msk.bf16.gmra.mxu1 %vm739_vm0, %v3051_v37 }
 0x1c0   : > { %v1882_v55 = vadd.f32 %v1881_v34, %v1662_v51  ;;  %v3052_v34 = vld [vmem:[%s3380_s12 + $0xd8] sm:$0xff] }
 0x1c1   : > { %v2015_v57 = vadd.f32 %v2014_v35, %v1663_v54  ;;  %v2935_v35 = vor.u32 %v3104_v32, %v2934_v31  ;;  %v3719_v54 = vpop.f32.mrf.mxu2 }
 0x1c2   : > { %4449 = vst [vmem:[#allocation18_spill] sm:$0xff] %v3719_v54 }
 0x1c3   : > { %v1033_v59 = vpop.f32.mrf.mxu0  ;;  %2337 = vmatpush.bf16.msrb.mxu2 %v2935_v35  ;;  %v3078_v35 = vld [vmem:[%s3380_s12 + $0x1a8] sm:$0xff] }
 0x1c4   : > { %v1034_v62 = vadd.f32 %v1033_v59, %v3410_v24  ;;  %v1362_v1 = vpop.f32.mrf.mxu1 }
 0x1c5   : > { %v1363_v7 = vadd.f32 %v1362_v1, %v3413_v25  ;;  %v3120_v1 = vld [vmem:[%s4432_s3 + $0xd4] sm:$0xf0]  ;;  %v3729_v31 = vpop.f32.mrf.mxu3 }
 0x1c6   : > { %v1664_v10 = vmax.f32 %v1034_v62, 0.0  ;;  %v2998_v62 = vld [vmem:[%s4432_s3 + $0xd0] sm:$0xf]  ;;  %4450 = vst [vmem:[#allocation19_spill] sm:$0xff] %v3729_v31 }
 0x1c7   : > { %v1665_v14 = vmax.f32 %v1363_v7, 0.0  ;;  %v2999_v7 = vor.u32 %v3120_v1, %v2998_v62 }
 0x1c8   : > { %v1883_v18 = vadd.f32 %v1882_v55, %v1664_v10 }
 0x1c9   : > { %v2016_v22 = vadd.f32 %v2015_v57, %v1665_v14  ;;  %2350 = vmatpush.bf16.msrb.mxu3 %v2999_v7  ;;  %v3732_v32 = vpop.f32.mrf.mxu2  ;;  %2817 = vmatmul.msk.bf16.gmra.mxu2 %vm739_vm0, %v3078_v35 }
 0x1ca   : > { %4451 = vst [vmem:[#allocation20_spill] sm:$0xff] %v3732_v32  ;;  %2881 = vmatmul.msk.bf16.gmra.mxu3 %vm739_vm0, %v3078_v35 }
 0x1cb   : > { %v1036_v37 = vpop.f32.mrf.mxu0 }
 0x1cc   : > { %v1037_v38 = vadd.f32 %v1036_v37, %v3410_v24  ;;  %v1365_v42 = vpop.f32.mrf.mxu1 }
 0x1cd   : > { %v1366_v50 = vadd.f32 %v1365_v42, %v3413_v25  ;;  %v3053_v42 = vld [vmem:[%s3380_s12 + $0xe0] sm:$0xff]  ;;  %v3739_v62 = vpop.f32.mrf.mxu3 }
 0x1ce   : > { %v1666_v51 = vmax.f32 %v1037_v38, 0.0  ;;  %2791 = vmatmul.msk.bf16.gmra.mxu0 %vm739_vm0, %v3052_v34  ;;  %4452 = vst [vmem:[#allocation21_spill] sm:$0xff] %v3739_v62  ;;  %v3079_v62 = vld [vmem:[%s3380_s12 + $0x1b0] sm:$0xff] }
 0x1cf   : > { %v1667_v55 = vmax.f32 %v1366_v50, 0.0  ;;  %2855 = vmatmul.msk.bf16.gmra.mxu1 %vm739_vm0, %v3052_v34 }
 0x1d0   : > { %v1884_v57 = vadd.f32 %v1883_v18, %v1666_v51 }
 0x1d1   : > { %v2017_v59 = vadd.f32 %v2016_v22, %v1667_v55 }
 0x1d3   : > { %v1038_v10 = vpop.f32.mrf.mxu0 }
 0x1d4   : > { %v1039_v14 = vadd.f32 %v1038_v10, %v3410_v24  ;;  %v1367_v15 = vpop.f32.mrf.mxu1  ;;  %v3743_v10 = vpop.f32.mrf.mxu2 }
 0x1d5   : > { %v1368_v18 = vadd.f32 %v1367_v15, %v3413_v25  ;;  %4453 = vst [vmem:[#allocation22_spill] sm:$0xff] %v3743_v10 }
 0x1d6   : > { %v1668_v22 = vmax.f32 %v1039_v14, 0.0 }
 0x1d7   : > { %v1669_v34 = vmax.f32 %v1368_v18, 0.0 }
 0x1d8   : > { %v1885_v37 = vadd.f32 %v1884_v57, %v1668_v22 }
 0x1d9   : > { %v2018_v38 = vadd.f32 %v2017_v59, %v1669_v34  ;;  %v3747_v34 = vpop.f32.mrf.mxu3  ;;  %2818 = vmatmul.msk.bf16.gmra.mxu2 %vm739_vm0, %v3079_v62 }
 0x1da   : > { %4454 = vst [vmem:[#allocation23_spill] sm:$0xff] %v3747_v34  ;;  %2882 = vmatmul.msk.bf16.gmra.mxu3 %vm739_vm0, %v3079_v62 }
 0x1db   : > { %v1041_v50 = vpop.f32.mrf.mxu0 }
 0x1dc   : > { %v1042_v51 = vadd.f32 %v1041_v50, %v3410_v24  ;;  %v1370_v55 = vpop.f32.mrf.mxu1 }
 0x1dd   : > { %v1371_v1 = vadd.f32 %v1370_v55, %v3413_v25 }
 0x1de   : > { %v1670_v7 = vmax.f32 %v1042_v51, 0.0  ;;  %2792 = vmatmul.msk.bf16.gmra.mxu0 %vm739_vm0, %v3053_v42  ;;  %v3750_v51 = vpop.f32.mrf.mxu2 }
 0x1df   : > { %v1671_v57 = vmax.f32 %v1371_v1, 0.0  ;;  %2856 = vmatmul.msk.bf16.gmra.mxu1 %vm739_vm0, %v3053_v42  ;;  %4455 = vst [vmem:[#allocation24_spill] sm:$0xff] %v3750_v51  ;;  %v3080_v51 = vld [vmem:[%s3380_s12 + $0x1b8] sm:$0xff] }
 0x1e0   : > { %v1886_v59 = vadd.f32 %v1885_v37, %v1670_v7  ;;  %v3054_v37 = vld [vmem:[%s3380_s12 + $0xe8] sm:$0xff] }
 0x1e1   : > { %v2019_v14 = vadd.f32 %v2018_v38, %v1671_v57  ;;  %v3757_v57 = vpop.f32.mrf.mxu3 }
 0x1e2   : > { %4456 = vst [vmem:[#allocation25_spill] sm:$0xff] %v3757_v57 }
 0x1e3   : > { %v1043_v15 = vpop.f32.mrf.mxu0 }
 0x1e4   : > { %v1044_v18 = vadd.f32 %v1043_v15, %v3410_v24  ;;  %v1372_v22 = vpop.f32.mrf.mxu1 }
 0x1e5   : > { %v1373_v35 = vadd.f32 %v1372_v22, %v3413_v25 }
 0x1e6   : > { %v1672_v50 = vmax.f32 %v1044_v18, 0.0  ;;  %v3761_v22 = vpop.f32.mrf.mxu2 }
 0x1e7   : > { %v1673_v55 = vmax.f32 %v1373_v35, 0.0  ;;  %4457 = vst [vmem:[#allocation26_spill] sm:$0xff] %v3761_v22 }
 0x1e8   : > { %v1887_v10 = vadd.f32 %v1886_v59, %v1672_v50 }
 0x1e9   : > { %v2020_v1 = vadd.f32 %v2019_v14, %v1673_v55  ;;  %2819 = vmatmul.msk.bf16.gmra.mxu2 %vm739_vm0, %v3080_v51 }
 0x1ea   : > { %2883 = vmatmul.msk.bf16.gmra.mxu3 %vm739_vm0, %v3080_v51 }
 0x1eb   : > { %v1046_v38 = vpop.f32.mrf.mxu0 }
 0x1ec   : > { %v1047_v42 = vadd.f32 %v1046_v38, %v3410_v24  ;;  %v1375_v7 = vpop.f32.mrf.mxu1  ;;  %v3765_v38 = vpop.f32.mrf.mxu3 }
 0x1ed   : > { %v1376_v15 = vadd.f32 %v1375_v7, %v3413_v25  ;;  %4458 = vst [vmem:[#allocation27_spill] sm:$0xff] %v3765_v38 }
 0x1ee   : > { %v1674_v18 = vmax.f32 %v1047_v42, 0.0  ;;  %2793 = vmatmul.msk.bf16.gmra.mxu0 %vm739_vm0, %v3054_v37  ;;  %v3768_v42 = vpop.f32.mrf.mxu2 }
 0x1ef   : > { %v1675_v59 = vmax.f32 %v1376_v15, 0.0  ;;  %2857 = vmatmul.msk.bf16.gmra.mxu1 %vm739_vm0, %v3054_v37  ;;  %4459 = vst [vmem:[#allocation28_spill] sm:$0xff] %v3768_v42  ;;  %v3081_v42 = vld [vmem:[%s3380_s12 + $0x1c0] sm:$0xff] }
 0x1f0   : > { %v1888_v62 = vadd.f32 %v1887_v10, %v1674_v18  ;;  %v3055_v10 = vld [vmem:[%s3380_s12 + $0xf0] sm:$0xff] }
 0x1f1   : > { %v2021_v14 = vadd.f32 %v2020_v1, %v1675_v59 }
 0x1f3   : > { %v1048_v35 = vpop.f32.mrf.mxu0 }
 0x1f4   : > { %v1049_v50 = vadd.f32 %v1048_v35, %v3410_v24  ;;  %v1377_v55 = vpop.f32.mrf.mxu1  ;;  %v3775_v59 = vpop.f32.mrf.mxu3 }
 0x1f5   : > { %v1378_v7 = vadd.f32 %v1377_v55, %v3413_v25  ;;  %4460 = vst [vmem:[#allocation29_spill] sm:$0xff] %v3775_v59 }
 0x1f6   : > { %v1676_v57 = vmax.f32 %v1049_v50, 0.0  ;;  %v3779_v55 = vpop.f32.mrf.mxu2 }
 0x1f7   : > { %v1677_v34 = vmax.f32 %v1378_v7, 0.0  ;;  %4461 = vst [vmem:[#allocation30_spill] sm:$0xff] %v3779_v55 }
 0x1f8   : > { %v1889_v22 = vadd.f32 %v1888_v62, %v1676_v57 }
 0x1f9   : > { %v2022_v15 = vadd.f32 %v2021_v14, %v1677_v34  ;;  %2820 = vmatmul.msk.bf16.gmra.mxu2 %vm739_vm0, %v3081_v42 }
 0x1fa   : > { %2884 = vmatmul.msk.bf16.gmra.mxu3 %vm739_vm0, %v3081_v42 }
 0x1fb   : > { %v1051_v1 = vpop.f32.mrf.mxu0 }
 0x1fc   : > { %v1052_v37 = vadd.f32 %v1051_v1, %v3410_v24  ;;  %v1380_v18 = vpop.f32.mrf.mxu1  ;;  %v3783_v1 = vpop.f32.mrf.mxu3 }
 0x1fd   : > { %v1381_v35 = vadd.f32 %v1380_v18, %v3413_v25  ;;  %4462 = vst [vmem:[#allocation31_spill] sm:$0xff] %v3783_v1 }
 0x1fe   : > { %v1678_v50 = vmax.f32 %v1052_v37, 0.0  ;;  %2794 = vmatmul.msk.bf16.gmra.mxu0 %vm739_vm0, %v3055_v10  ;;  %v3786_v37 = vpop.f32.mrf.mxu2 }
 0x1ff   : > { %v1679_v34 = vmax.f32 %v1381_v35, 0.0  ;;  %2858 = vmatmul.msk.bf16.gmra.mxu1 %vm739_vm0, %v3055_v10  ;;  %4463 = vst [vmem:[#allocation32_spill] sm:$0xff] %v3786_v37  ;;  %v3056_v10 = vld [vmem:[%s3380_s12 + $0xf8] sm:$0xff]  ;;  %v3082_v37 = vld [vmem:[%s3380_s12 + $0x1c8] sm:$0xff] }
 0x200   : > { %v1890_v57 = vadd.f32 %v1889_v22, %v1678_v50  ;;  %v2926_v22 = vld [vmem:[%s4432_s3 + $0x40] sm:$0xf] }
 0x201   : > { %v2023_v51 = vadd.f32 %v2022_v15, %v1679_v34  ;;  %v3102_v15 = vld [vmem:[%s4432_s3 + $0x44] sm:$0xf0]  ;;  %v2990_v34 = vld [vmem:[%s4432_s3 + $0xc0] sm:$0xf] }
 0x202   : > { %v2927_v50 = vor.u32 %v3102_v15, %v2926_v22 }
 0x203   : > { %v1053_v62 = vpop.f32.mrf.mxu0 }
 0x204   : > { %v1054_v14 = vadd.f32 %v1053_v62, %v3410_v24  ;;  %v1382_v7 = vpop.f32.mrf.mxu1  ;;  %2338 = vmatpush.bf16.msrb.mxu2 %v2927_v50 }
 0x205   : > { %v1383_v18 = vadd.f32 %v1382_v7, %v3413_v25 }
 0x206   : > { %v1680_v59 = vmax.f32 %v1054_v14, 0.0  ;;  %v3805_v14 = vpop.f32.mrf.mxu3 }
 0x207   : > { %v1681_v38 = vmax.f32 %v1383_v18, 0.0  ;;  %4464 = vst [vmem:[#allocation33_spill] sm:$0xff] %v3805_v14  ;;  %v3809_v18 = vpop.f32.mrf.mxu2 }
 0x208   : > { %v1891_v55 = vadd.f32 %v1890_v57, %v1680_v59  ;;  %4465 = vst [vmem:[#allocation34_spill] sm:$0xff] %v3809_v18 }
 0x209   : > { %v2024_v35 = vadd.f32 %v2023_v51, %v1681_v38  ;;  %v3118_v38 = vld [vmem:[%s4432_s3 + $0xc4] sm:$0xf0]  ;;  %2821 = vmatmul.msk.bf16.gmra.mxu2 %vm739_vm0, %v3082_v37 }
 0x20a   : > { %v2991_v57 = vor.u32 %v3118_v38, %v2990_v34  ;;  %2885 = vmatmul.msk.bf16.gmra.mxu3 %vm739_vm0, %v3082_v37 }
 0x20b   : > { %v1056_v59 = vpop.f32.mrf.mxu0 }
 0x20c   : > { %v1057_v51 = vadd.f32 %v1056_v59, %v3410_v24  ;;  %v1385_v62 = vpop.f32.mrf.mxu1  ;;  %2351 = vmatpush.bf16.msrb.mxu3 %v2991_v57 }
 0x20d   : > { %v1386_v42 = vadd.f32 %v1385_v62, %v3413_v25 }
 0x20e   : > { %v1682_v7 = vmax.f32 %v1057_v51, 0.0  ;;  %2795 = vmatmul.msk.bf16.gmra.mxu0 %vm739_vm0, %v3056_v10  ;;  %v3813_v14 = vpop.f32.mrf.mxu3 }
 0x20f   : > { %v1683_v22 = vmax.f32 %v1386_v42, 0.0  ;;  %2859 = vmatmul.msk.bf16.gmra.mxu1 %vm739_vm0, %v3056_v10  ;;  %4466 = vst [vmem:[#allocation35_spill] sm:$0xff] %v3813_v14  ;;  %v3816_v51 = vpop.f32.mrf.mxu2 }
 0x210   : > { %v1892_v15 = vadd.f32 %v1891_v55, %v1682_v7  ;;  %4467 = vst [vmem:[#allocation36_spill] sm:$0xff] %v3816_v51  ;;  %v3057_v55 = vld [vmem:[%s3380_s12 + $0x100] sm:$0xff]  ;;  %v3083_v51 = vld [vmem:[%s3380_s12 + $0x1d0] sm:$0xff] }
 0x211   : > { %v2025_v34 = vadd.f32 %v2024_v35, %v1683_v22 }
 0x213   : > { %v1058_v38 = vpop.f32.mrf.mxu0 }
 0x214   : > { %v1059_v50 = vadd.f32 %v1058_v38, %v3410_v24  ;;  %v1387_v59 = vpop.f32.mrf.mxu1 }
 0x215   : > { %v1388_v57 = vadd.f32 %v1387_v59, %v3413_v25 }
 0x216   : > { %v1684_v62 = vmax.f32 %v1059_v50, 0.0  ;;  %v3823_v22 = vpop.f32.mrf.mxu3 }
 0x217   : > { %v1685_v1 = vmax.f32 %v1388_v57, 0.0  ;;  %4468 = vst [vmem:[#allocation37_spill] sm:$0xff] %v3823_v22  ;;  %v3827_v59 = vpop.f32.mrf.mxu2 }
 0x218   : > { %v1893_v18 = vadd.f32 %v1892_v15, %v1684_v62  ;;  %4469 = vst [vmem:[#allocation38_spill] sm:$0xff] %v3827_v59 }
 0x219   : > { %v2026_v42 = vadd.f32 %v2025_v34, %v1685_v1  ;;  %2822 = vmatmul.msk.bf16.gmra.mxu2 %vm739_vm0, %v3083_v51 }
 0x21a   : > { %2886 = vmatmul.msk.bf16.gmra.mxu3 %vm739_vm0, %v3083_v51 }
 0x21b   : > { %v1061_v35 = vpop.f32.mrf.mxu0 }
 0x21c   : > { %v1062_v10 = vadd.f32 %v1061_v35, %v3410_v24  ;;  %v1390_v7 = vpop.f32.mrf.mxu1 }
 0x21d   : > { %v1391_v38 = vadd.f32 %v1390_v7, %v3413_v25 }
 0x21e   : > { %v1686_v50 = vmax.f32 %v1062_v10, 0.0  ;;  %2796 = vmatmul.msk.bf16.gmra.mxu0 %vm739_vm0, %v3057_v55  ;;  %v3831_v35 = vpop.f32.mrf.mxu3 }
 0x21f   : > { %v1687_v1 = vmax.f32 %v1391_v38, 0.0  ;;  %2860 = vmatmul.msk.bf16.gmra.mxu1 %vm739_vm0, %v3057_v55  ;;  %4470 = vst [vmem:[#allocation39_spill] sm:$0xff] %v3831_v35  ;;  %v3834_v10 = vpop.f32.mrf.mxu2 }
 0x220   : > { %v1894_v37 = vadd.f32 %v1893_v18, %v1686_v50  ;;  %4471 = vst [vmem:[#allocation40_spill] sm:$0xff] %v3834_v10  ;;  %v3058_v18 = vld [vmem:[%s3380_s12 + $0x108] sm:$0xff]  ;;  %v3084_v10 = vld [vmem:[%s3380_s12 + $0x1d8] sm:$0xff] }
 0x221   : > { %v2027_v15 = vadd.f32 %v2026_v42, %v1687_v1 }
 0x223   : > { %v1063_v34 = vpop.f32.mrf.mxu0 }
 0x224   : > { %v1064_v57 = vadd.f32 %v1063_v34, %v3410_v24  ;;  %v1392_v62 = vpop.f32.mrf.mxu1 }
 0x225   : > { %v1393_v7 = vadd.f32 %v1392_v62, %v3413_v25 }
 0x226   : > { %v1688_v22 = vmax.f32 %v1064_v57, 0.0  ;;  %v3841_v1 = vpop.f32.mrf.mxu3 }
 0x227   : > { %v1689_v14 = vmax.f32 %v1393_v7, 0.0  ;;  %4472 = vst [vmem:[#allocation41_spill] sm:$0xff] %v3841_v1  ;;  %v3845_v62 = vpop.f32.mrf.mxu2 }
 0x228   : > { %v1895_v59 = vadd.f32 %v1894_v37, %v1688_v22  ;;  %4473 = vst [vmem:[#allocation42_spill] sm:$0xff] %v3845_v62 }
 0x229   : > { %v2028_v38 = vadd.f32 %v2027_v15, %v1689_v14  ;;  %2823 = vmatmul.msk.bf16.gmra.mxu2 %vm739_vm0, %v3084_v10 }
 0x22a   : > { %2887 = vmatmul.msk.bf16.gmra.mxu3 %vm739_vm0, %v3084_v10  ;;  %v3100_v10 = vld [vmem:[%s4432_s3 + $0x34] sm:$0xf0] }
 0x22b   : > { %v1066_v42 = vpop.f32.mrf.mxu0 }
 0x22c   : > { %v1067_v55 = vadd.f32 %v1066_v42, %v3410_v24  ;;  %v1395_v50 = vpop.f32.mrf.mxu1 }
 0x22d   : > { %v1396_v34 = vadd.f32 %v1395_v50, %v3413_v25 }
 0x22e   : > { %v1690_v57 = vmax.f32 %v1067_v55, 0.0  ;;  %2797 = vmatmul.msk.bf16.gmra.mxu0 %vm739_vm0, %v3058_v18  ;;  %v3849_v42 = vpop.f32.mrf.mxu3 }
 0x22f   : > { %v1691_v14 = vmax.f32 %v1396_v34, 0.0  ;;  %2861 = vmatmul.msk.bf16.gmra.mxu1 %vm739_vm0, %v3058_v18  ;;  %4474 = vst [vmem:[#allocation43_spill] sm:$0xff] %v3849_v42  ;;  %v3852_v35 = vpop.f32.mrf.mxu2 }
 0x230   : > { %v1896_v22 = vadd.f32 %v1895_v59, %v1690_v57  ;;  %4475 = vst [vmem:[#allocation44_spill] sm:$0xff] %v3852_v35  ;;  %v3086_v35 = vld [vmem:[%s3380_s12 + $0x1e8] sm:$0xff] }
 0x231   : > { %v2029_v51 = vadd.f32 %v2028_v38, %v1691_v14 }
 0x233   : > { %v1068_v37 = vpop.f32.mrf.mxu0 }
 0x234   : > { %v1069_v15 = vadd.f32 %v1068_v37, %v3410_v24  ;;  %v1397_v7 = vpop.f32.mrf.mxu1 }
 0x235   : > { %v1398_v1 = vadd.f32 %v1397_v7, %v3413_v25 }
 0x236   : > { %v1692_v50 = vmax.f32 %v1069_v15, 0.0  ;;  %v3858_v34 = vpop.f32.mrf.mxu3 }
 0x237   : > { %v1693_v55 = vmax.f32 %v1398_v1, 0.0  ;;  %4476 = vst [vmem:[#allocation45_spill] sm:$0xff] %v3858_v34  ;;  %v3861_v37 = vpop.f32.mrf.mxu2 }
 0x238   : > { %v1897_v31 = vadd.f32 %v1896_v22, %v1692_v50  ;;  %4477 = vst [vmem:[#allocation46_spill] sm:$0xff] %v3861_v37 }
 0x239   : > { %v2030_v62 = vadd.f32 %v2029_v51, %v1693_v55  ;;  %v2918_v51 = vld [vmem:[%s4432_s3 + $0x30] sm:$0xf] }
 0x23a   : > { %v2919_v7 = vor.u32 %v3100_v10, %v2918_v51  ;;  %v2982_v51 = vld [vmem:[%s4432_s3 + $0xb0] sm:$0xf]  ;;  %v3116_v10 = vld [vmem:[%s4432_s3 + $0xb4] sm:$0xf0] }
 0x23b   : > { %v1071_v59 = vpop.f32.mrf.mxu0 }
 0x23c   : > { %v1072_v38 = vadd.f32 %v1071_v59, %v3410_v24  ;;  %v1400_v18 = vpop.f32.mrf.mxu1  ;;  %2339 = vmatpush.bf16.msrb.mxu2 %v2919_v7  ;;  %v2983_v7 = vor.u32 %v3116_v10, %v2982_v51 }
 0x23d   : > { %v1401_v57 = vadd.f32 %v1400_v18, %v3413_v25 }
 0x23e   : > { %v1694_v14 = vmax.f32 %v1072_v38, 0.0  ;;  %v3870_v38 = vpop.f32.mrf.mxu3  ;;  %2352 = vmatpush.bf16.msrb.mxu3 %v2983_v7 }
 0x23f   : > { %v1695_v1 = vmax.f32 %v1401_v57, 0.0  ;;  %4478 = vst [vmem:[#allocation47_spill] sm:$0xff] %v3870_v38 }
 0x240   : > { %v1898_v15 = vadd.f32 %v1897_v31, %v1694_v14  ;;  %v3085_v14 = vld [vmem:[%s3380_s12 + $0x1e0] sm:$0xff] }
 0x241   : > { %v2031_v22 = vadd.f32 %v2030_v62, %v1695_v1  ;;  %v3873_v62 = vpop.f32.mrf.mxu2  ;;  %2888 = vmatmul.msk.bf16.gmra.mxu3 %vm739_vm0, %v3085_v14  ;;  %2824 = vmatmul.msk.bf16.gmra.mxu2 %vm739_vm0, %v3085_v14 }
 0x242   : > { %4479 = vst [vmem:[#allocation48_spill] sm:$0xff] %v3873_v62 }
 0x243   : > { %v1073_v50 = vpop.f32.mrf.mxu0 }
 0x244   : > { %v1074_v55 = vadd.f32 %v1073_v50, %v3410_v24  ;;  %v1402_v59 = vpop.f32.mrf.mxu1 }
 0x245   : > { %v1403_v18 = vadd.f32 %v1402_v59, %v3413_v25 }
 0x246   : > { %v1696_v31 = vmax.f32 %v1074_v55, 0.0 }
 0x247   : > { %v1697_v57 = vmax.f32 %v1403_v18, 0.0 }
 0x248   : > { %v1899_v1 = vadd.f32 %v1898_v15, %v1696_v31  ;;  %v3885_v15 = vpop.f32.mrf.mxu3 }
 0x249   : > { %v2032_v34 = vadd.f32 %v2031_v22, %v1697_v57  ;;  %4480 = vst [vmem:[#allocation49_spill] sm:$0xff] %v3885_v15  ;;  %v3888_v31 = vpop.f32.mrf.mxu2 }
 0x24a   : > { %4481 = vst [vmem:[#allocation50_spill] sm:$0xff] %v3888_v31 }
 0x24b   : > { %v1076_v50 = vpop.f32.mrf.mxu0 }
 0x24c   : > { %v1077_v55 = vadd.f32 %v1076_v50, %v3410_v24  ;;  %v1405_v59 = vpop.f32.mrf.mxu1 }
 0x24d   : > { %v1406_v22 = vadd.f32 %v1405_v59, %v3413_v25 }
 0x24e   : > { %v1698_v18 = vmax.f32 %v1077_v55, 0.0 }
 0x24f   : > { %v1699_v57 = vmax.f32 %v1406_v22, 0.0 }
 0x250   : > { %v1900_v38 = vadd.f32 %v1899_v1, %v1698_v18  ;;  %v3891_v10 = vpop.f32.mrf.mxu3 }
 0x251   : > { %v2033_v62 = vadd.f32 %v2032_v34, %v1699_v57  ;;  %4482 = vst [vmem:[#allocation51_spill] sm:$0xff] %v3891_v10  ;;  %v3894_v42 = vpop.f32.mrf.mxu2  ;;  %2889 = vmatmul.msk.bf16.gmra.mxu3 %vm739_vm0, %v3086_v35  ;;  %2825 = vmatmul.msk.bf16.gmra.mxu2 %vm739_vm0, %v3086_v35  ;;  %v3087_v10 = vld [vmem:[%s3380_s12 + $0x1f0] sm:$0xff] }
 0x252   : > { %4483 = vst [vmem:[#allocation52_spill] sm:$0xff] %v3894_v42 }
 0x253   : > { %v1078_v37 = vpop.f32.mrf.mxu0 }
 0x254   : > { %v1079_v14 = vadd.f32 %v1078_v37, %v3410_v24  ;;  %v1407_v51 = vpop.f32.mrf.mxu1 }
 0x255   : > { %v1408_v50 = vadd.f32 %v1407_v51, %v3413_v25 }
 0x256   : > { %v1700_v7 = vmax.f32 %v1079_v14, 0.0 }
 0x257   : > { %v1701_v15 = vmax.f32 %v1408_v50, 0.0 }
 0x258   : > { %v1901_v59 = vadd.f32 %v1900_v38, %v1700_v7  ;;  %v3900_v22 = vpop.f32.mrf.mxu3 }
 0x259   : > { %v2034_v55 = vadd.f32 %v2033_v62, %v1701_v15  ;;  %4484 = vst [vmem:[#allocation53_spill] sm:$0xff] %v3900_v22  ;;  %v3903_v14 = vpop.f32.mrf.mxu2 }
 0x25a   : > { %4485 = vst [vmem:[#allocation54_spill] sm:$0xff] %v3903_v14 }
 0x25b   : > { %v1081_v34 = vpop.f32.mrf.mxu0 }
 0x25c   : > { %v1082_v37 = vadd.f32 %v1081_v34, %v3410_v24  ;;  %v1410_v1 = vpop.f32.mrf.mxu1 }
 0x25d   : > { %v1411_v18 = vadd.f32 %v1410_v1, %v3413_v25 }
 0x25e   : > { %v1702_v57 = vmax.f32 %v1082_v37, 0.0 }
 0x25f   : > { %v1703_v51 = vmax.f32 %v1411_v18, 0.0 }
 0x260   : > { %v1902_v50 = vadd.f32 %v1901_v59, %v1702_v57  ;;  %v3905_v7 = vpop.f32.mrf.mxu3 }
 0x261   : > { %v2035_v38 = vadd.f32 %v2034_v55, %v1703_v51  ;;  %4486 = vst [vmem:[#allocation55_spill] sm:$0xff] %v3905_v7  ;;  %v3907_v35 = vpop.f32.mrf.mxu2  ;;  %2890 = vmatmul.msk.bf16.gmra.mxu3 %vm739_vm0, %v3087_v10  ;;  %2826 = vmatmul.msk.bf16.gmra.mxu2 %vm739_vm0, %v3087_v10  ;;  %v3088_v51 = vld [vmem:[%s3380_s12 + $0x1f8] sm:$0xff]  ;;  %s2406_s12 = scalar_lea.hbm %s4434_s5, %s3021_s15 }
 0x262   : > { %4487 = vst [vmem:[#allocation56_spill] sm:$0xff] %v3907_v35  ;;  %s2410_s27 = sshll.u32 %s2406_s12, 4  ;;  %s2411_s27 = int_to_ptr.hbm [resolvable:$true] %s2410_s27 }
 0x263   : > { %v1083_v62 = vpop.f32.mrf.mxu0  ;;  %s3199_s29 = sshra.s32 %s2411_s27, 4  ;;  %s3200_s29 = int_to_ptr.hbm [resolvable:$true] %s3199_s29 }
 0x264   : > { %v1412_v15 = vpop.f32.mrf.mxu1  ;;  %s3201_s7 = scalar_lea.hbm %s3200_s29, 2  ;;  %p3206_p1 = scmp.lt.s32.totalorder %s3200_s29, %s4434_s5 }
 0x265   : > { %p3202_p12 = scmp.ne.s32.totalorder %s3200_s29, %s3201_s7  ;;  %p3207_p2 = scmp.lt.s32.totalorder %s3205_s10, %s3201_s7 }
 0x267   : > { %p3203_p13 = pnand %p3202_p12, %p3336_p4  ;;  %p3208_p3 = por %p3207_p2, %p3206_p1 }
 0x268   : > { %v3912_v37 = vpop.f32.mrf.mxu3 }
 0x269   : > { %4488 = vst [vmem:[#allocation57_spill] sm:$0xff] %v3912_v37  ;;  %v3914_v22 = vpop.f32.mrf.mxu2  ;;  %v2910_v37 = vld [vmem:[%s4432_s3 + $0x20] sm:$0xf]  ;;  %p3204_p0 = pneg %p3203_p13 }
 0x26a   : > { %4489 = vst [vmem:[#allocation58_spill] sm:$0xff] %v3914_v22 }
 0x26b   : > { %v1086_v34 = vpop.f32.mrf.mxu0  ;;  %p3209_p5 = pnand %p3208_p3, %p3204_p0 }
 0x26c   : > { %v1415_v1 = vpop.f32.mrf.mxu1 }
 0x270   : > { %v3916_v18 = vpop.f32.mrf.mxu3 }
 0x271   : > { %4490 = vst [vmem:[#allocation59_spill] sm:$0xff] %v3916_v18  ;;  %v3918_v57 = vpop.f32.mrf.mxu2  ;;  %2891 = vmatmul.msk.bf16.gmra.mxu3 %vm739_vm0, %v3088_v51  ;;  %2827 = vmatmul.msk.bf16.gmra.mxu2 %vm739_vm0, %v3088_v51  ;;  %v3098_v18 = vld [vmem:[%s4432_s3 + $0x24] sm:$0xf0] }
 0x272   : > { %4491 = vst [vmem:[#allocation60_spill] sm:$0xff] %v3918_v57  ;;  %v2974_v57 = vld [vmem:[%s4432_s3 + $0xa0] sm:$0xf]  ;;  %v2911_v22 = vor.u32 %v3098_v18, %v2910_v37  ;;  %v3114_v51 = vld [vmem:[%s4432_s3 + $0xa4] sm:$0xf0] }
 0x273   : > { %v1088_v59 = vpop.f32.mrf.mxu0  ;;  %v2975_v42 = vor.u32 %v3114_v51, %v2974_v57  ;;  %v1084_v57 = vadd.f32 %v1083_v62, %v3410_v24 }
 0x274   : > { %v1417_v55 = vpop.f32.mrf.mxu1  ;;  %2340 = vmatpush.bf16.msrb.mxu2 %v2911_v22 }
 0x275   : > { %2353 = vmatpush.bf16.msrb.mxu3 %v2975_v42  ;;  %v1413_v42 = vadd.f32 %v1412_v15, %v3413_v25  ;;  %v1704_v17 = vmax.f32 %v1084_v57, 0.0  ;;  %v1418_v28 = vadd.f32 %v1417_v55, %v3413_v25 }
 0x278   : > { %v3923_v10 = vpop.f32.mrf.mxu3 }
 0x279   : > { %4492 = vst [vmem:[#allocation61_spill] sm:$0xff] %v3923_v10  ;;  %v3925_v14 = vpop.f32.mrf.mxu2 }
 0x27a   : > { %4493 = vst [vmem:[#allocation62_spill] sm:$0xff] %v3925_v14 }
 0x27b   : > { %v1091_v7 = vpop.f32.mrf.mxu0 }
 0x27c   : > { %v1420_v35 = vpop.f32.mrf.mxu1 }
 0x27d   : > { %v1421_v62 = vadd.f32 %v1420_v35, %v3413_v25 }
 0x27f   : > { %v1711_v35 = vmax.f32 %v1421_v62, 0.0 }
 0x280   : > { %v3941_v32 = vpop.f32.mrf.mxu3 }
 0x281   : > { %v3939_v31 = vpop.f32.mrf.mxu2  ;;  %4495 = vst [vmem:[#allocation64_spill] sm:$0xff] %v3941_v32  ;;  %v1087_v32 = vadd.f32 %v1086_v34, %v3410_v24 }
 0x282   : > { %4494 = vst [vmem:[#allocation63_spill] sm:$0xff] %v3939_v31  ;;  %v1416_v31 = vadd.f32 %v1415_v1, %v3413_v25  ;;  %v1709_v1 = vmax.f32 %v1418_v28, 0.0 }
 0x283   : > { %v1093_v10 = vpop.f32.mrf.mxu0  ;;  %v1706_v60 = vmax.f32 %v1087_v32, 0.0 }
 0x284   : > { %v1422_v14 = vpop.f32.mrf.mxu1  ;;  %v1707_v3 = vmax.f32 %v1416_v31, 0.0  ;;  %v1094_v15 = vadd.f32 %v1093_v10, %v3410_v24 }
 0x285   : > { %v1423_v57 = vadd.f32 %v1422_v14, %v3413_v25 }
 0x287   : > { %v1713_v28 = vmax.f32 %v1423_v57, 0.0 }
 0x288   : > { %v3945_v11 = vpop.f32.mrf.mxu3 }
 0x289   : > { %v3943_v6 = vpop.f32.mrf.mxu2  ;;  %4497 = vst [vmem:[#allocation66_spill] sm:$0xff] %v3945_v11  ;;  %v1705_v11 = vmax.f32 %v1413_v42, 0.0 }
 0x28a   : > { %4496 = vst [vmem:[#allocation65_spill] sm:$0xff] %v3943_v6  ;;  %v1089_v6 = vadd.f32 %v1088_v59, %v3410_v24 }
 0x28b   : > { %v1096_v46 = vpop.f32.mrf.mxu0  ;;  %v2036_v20 = vadd.f32 %v2035_v38, %v1705_v11 }
 0x28c   : > { %v1425_v54 = vpop.f32.mrf.mxu1  ;;  %v1708_v47 = vmax.f32 %v1089_v6, 0.0  ;;  %v1097_v32 = vadd.f32 %v1096_v46, %v3410_v24 }
 0x28d   : > { %v2037_v31 = vadd.f32 %v2036_v20, %v1707_v3 }
 0x28f   : > { %v2038_v11 = vadd.f32 %v2037_v31, %v1709_v1 }
 0x290   : > { %v3950_v22 = vpop.f32.mrf.mxu3 }
 0x291   : > { %v3947_v52 = vpop.f32.mrf.mxu2  ;;  %4499 = vst [vmem:[#allocation68_spill] sm:$0xff] %v3950_v22  ;;  %v1903_v22 = vadd.f32 %v1902_v50, %v1704_v17  ;;  %v1426_v17 = vadd.f32 %v1425_v54, %v3413_v25  ;;  %v1712_v50 = vmax.f32 %v1094_v15, 0.0 }
 0x292   : > { %4498 = vst [vmem:[#allocation67_spill] sm:$0xff] %v3947_v52  ;;  %v1092_v52 = vadd.f32 %v1091_v7, %v3410_v24 }
 0x293   : > { %v1098_v37 = vpop.f32.mrf.mxu0  ;;  %v1904_v42 = vadd.f32 %v1903_v22, %v1706_v60  ;;  %v1715_v46 = vmax.f32 %v1426_v17, 0.0 }
 0x294   : > { %v1427_v18 = vpop.f32.mrf.mxu1  ;;  %v1710_v55 = vmax.f32 %v1092_v52, 0.0  ;;  %v1099_v10 = vadd.f32 %v1098_v37, %v3410_v24  ;;  %v2039_v52 = vadd.f32 %v2038_v11, %v1711_v35 }
 0x295   : > { %v1905_v6 = vadd.f32 %v1904_v42, %v1708_v47  ;;  %v1428_v14 = vadd.f32 %v1427_v18, %v3413_v25 }
 0x296   : > { %v1716_v62 = vmax.f32 %v1099_v10, 0.0  ;;  %v2040_v15 = vadd.f32 %v2039_v52, %v1713_v28  ;;  %v1112_v28 = vadd.f32 %v3509_v2, %v3410_v24  ;;  %v1441_v52 = vadd.f32 %v3505_v63, %v3413_v25 }
 0x297   : > { %v1906_v38 = vadd.f32 %v1905_v6, %v1710_v55  ;;  %v1717_v37 = vmax.f32 %v1428_v14, 0.0  ;;  %v1446_v63 = vadd.f32 %v3523_v21, %v3413_v25 }
 0x298   : > { %v3964_v7 = vpop.f32.mrf.mxu3  ;;  %v2041_v55 = vadd.f32 %v2040_v15, %v1715_v46  ;;  %v1726_v15 = vmax.f32 %v1112_v28, 0.0 }
 0x299   : > { %v3961_v59 = vpop.f32.mrf.mxu2  ;;  %v1907_v3 = vadd.f32 %v1906_v38, %v1712_v50 }
 0x29a   : > { %4500 = vst [vmem:[#allocation69_spill] sm:$0xff] %v3961_v59  ;;  %v1714_v59 = vmax.f32 %v1097_v32, 0.0 }
 0x29b   : > { %v1101_v49 = vpop.f32.mrf.mxu0 }
 0x29c   : > { %v1430_v51 = vpop.f32.mrf.mxu1  ;;  %v1102_v60 = vadd.f32 %v1101_v49, %v3410_v24  ;;  %v1908_v57 = vadd.f32 %v1907_v3, %v1714_v59 }
 0x29d   : > { %v1431_v22 = vadd.f32 %v1430_v51, %v3413_v25 }
 0x29e   : > { %v1718_v18 = vmax.f32 %v1102_v60, 0.0  ;;  %v1909_v51 = vadd.f32 %v1908_v57, %v1716_v62  ;;  %v1727_v57 = vmax.f32 %v1441_v52, 0.0 }
 0x29f   : > { %v1719_v49 = vmax.f32 %v1431_v22, 0.0 }
 0x2a0   : > { %v3977_v17 = vpop.f32.mrf.mxu3  ;;  %v1910_v50 = vadd.f32 %v1909_v51, %v1718_v18  ;;  %v1448_v51 = vadd.f32 %v3531_v33, %v3413_v25  ;;  %v1453_v33 = vadd.f32 %v3555_v58, %v3413_v25  ;;  %v1458_v58 = vadd.f32 %v3579_v27, %v3413_v25 }
 0x2a1   : > { %v3975_v31 = vpop.f32.mrf.mxu2 }
 0x2a3   : > { %v1103_v40 = vpop.f32.mrf.mxu0 }
 0x2a4   : > { %v1432_v34 = vpop.f32.mrf.mxu1  ;;  %v1104_v47 = vadd.f32 %v1103_v40, %v3410_v24  ;;  %v2042_v40 = vadd.f32 %v2041_v55, %v1717_v37  ;;  %v1117_v37 = vadd.f32 %v3527_v26, %v3410_v24  ;;  %v1119_v55 = vadd.f32 %v3534_v36, %v3410_v24 }
 0x2a5   : > { %v1433_v1 = vadd.f32 %v1432_v34, %v3413_v25  ;;  %v1124_v36 = vadd.f32 %v3558_v61, %v3410_v24  ;;  %v1129_v61 = vadd.f32 %v3582_v30, %v3410_v24 }
 0x2a6   : > { %v1720_v35 = vmax.f32 %v1104_v47, 0.0  ;;  %v2043_v11 = vadd.f32 %v2042_v40, %v1719_v49  ;;  %v1443_v47 = vadd.f32 %v3513_v9, %v3413_v25  ;;  %v1122_v40 = vadd.f32 %v3545_v48, %v3410_v24 }
 0x2a7   : > { %v1721_v6 = vmax.f32 %v1433_v1, 0.0  ;;  %v1127_v48 = vadd.f32 %v3575_v16, %v3410_v24  ;;  %v1132_v16 = vadd.f32 %v3593_v44, %v3410_v24  ;;  %v1137_v44 = vadd.f32 %v3611_v8, %v3410_v24 }
 0x2a8   : > { %v1911_v14 = vadd.f32 %v1910_v50, %v1720_v35  ;;  %v3997_v9 = vpop.f32.mrf.mxu3  ;;  %v1730_v35 = vmax.f32 %v1117_v37, 0.0  ;;  %v1451_v50 = vadd.f32 %v3541_v45, %v3413_v25  ;;  %v1456_v45 = vadd.f32 %v3571_v13, %v3413_v25 }
 0x2a9   : > { %v2044_v46 = vadd.f32 %v2043_v11, %v1721_v6  ;;  %v1731_v6 = vmax.f32 %v1446_v63, 0.0  ;;  %v1732_v11 = vmax.f32 %v1119_v55, 0.0  ;;  %v1740_v37 = vmax.f32 %v1129_v61, 0.0 }
 0x2aa   : > { %v1739_v13 = vmax.f32 %v1456_v45, 0.0  ;;  %v1463_v63 = vadd.f32 %v3597_v53, %v3413_v25  ;;  %v1468_v53 = vadd.f32 %v3615_v19, %v3413_v25  ;;  %v1142_v8 = vadd.f32 %v3629_v43, %v3410_v24 }
 0x2ab   : > { %v1106_v20 = vpop.f32.mrf.mxu0 }
 0x2ac   : > { %v1435_v54 = vpop.f32.mrf.mxu1  ;;  %v1107_v42 = vadd.f32 %v1106_v20, %v3410_v24  ;;  %v1114_v20 = vadd.f32 %v3516_v12, %v3410_v24  ;;  %v1749_v19 = vmax.f32 %v1468_v53, 0.0 }
 0x2ad   : > { %v1436_v32 = vadd.f32 %v1435_v54, %v3413_v25 }
 0x2ae   : > { %v1722_v10 = vmax.f32 %v1107_v42, 0.0  ;;  %v3993_v42 = vpop.f32.mrf.mxu2  ;;  %v1728_v12 = vmax.f32 %v1114_v20, 0.0  ;;  %v1737_v20 = vmax.f32 %v1453_v33, 0.0  ;;  %v1473_v33 = vadd.f32 %v3645_v0, %v3413_v25 }
 0x2af   : > { %v1723_v34 = vmax.f32 %v1436_v32, 0.0  ;;  %v1729_v32 = vmax.f32 %v1443_v47, 0.0  ;;  %v1738_v47 = vmax.f32 %v1127_v48, 0.0 }
 0x2b0   : > { %v1912_v3 = vadd.f32 %v1911_v14, %v1722_v10  ;;  %v1734_v14 = vmax.f32 %v1122_v40, 0.0 }
 0x2b1   : > { %v2045_v54 = vadd.f32 %v2044_v46, %v1723_v34  ;;  %v1736_v46 = vmax.f32 %v1124_v36, 0.0 }
 0x2b3   : > { %v1108_v59 = vpop.f32.mrf.mxu0 }
 0x2b4   : > { %v1109_v38 = vadd.f32 %v1108_v59, %v3410_v24  ;;  %v1437_v60 = vpop.f32.mrf.mxu1  ;;  %v1733_v59 = vmax.f32 %v1448_v51, 0.0 }
 0x2b5   : > { %v1438_v22 = vadd.f32 %v1437_v60, %v3413_v25  ;;  %v1735_v60 = vmax.f32 %v1451_v50, 0.0 }
 0x2b6   : > { %v1724_v62 = vmax.f32 %v1109_v38, 0.0 }
 0x2b7   : > { %v1725_v2 = vmax.f32 %v1438_v22, 0.0 }
 0x2b8   : > { %v1913_v1 = vadd.f32 %v1912_v3, %v1724_v62  ;;  %v4017_v62 = vpop.f32.mrf.mxu2 }
 0x2b9   : > { %v2046_v18 = vadd.f32 %v2045_v54, %v1725_v2  ;;  %v4021_v2 = vpop.f32.mrf.mxu3 }
 0x2ba   : > { %v1914_v49 = vadd.f32 %v1913_v1, %v1726_v15  ;;  %v1461_v15 = vadd.f32 %v3589_v41, %v3413_v25  ;;  %v1134_v1 = vadd.f32 %v3600_v56, %v3410_v24  ;;  %v1466_v41 = vadd.f32 %v3607_v5, %v3413_v25 }
 0x2bb   : > { %v2047_v26 = vadd.f32 %v2046_v18, %v1727_v57  ;;  %v1741_v57 = vmax.f32 %v1458_v58, 0.0  ;;  %v1139_v56 = vadd.f32 %v3618_v23, %v3410_v24  ;;  %v1471_v5 = vadd.f32 %v3625_v39, %v3413_v25 }
 0x2bc   : > { %v1915_v21 = vadd.f32 %v1914_v49, %v1728_v12  ;;  %v1742_v12 = vmax.f32 %v1132_v16, 0.0  ;;  %v1743_v49 = vmax.f32 %v1461_v15, 0.0  ;;  %v1744_v51 = vmax.f32 %v1134_v1, 0.0  ;;  %v4506_v1 = vld [vmem:[#allocation12_spill] sm:$0xff] }
 0x2bd   : > { %v2048_v10 = vadd.f32 %v2047_v26, %v1729_v32  ;;  %v1747_v50 = vmax.f32 %v1466_v41, 0.0  ;;  %v1748_v36 = vmax.f32 %v1139_v56, 0.0  ;;  %v1144_v23 = vadd.f32 %v3648_v4, %v3410_v24  ;;  %v4502_v4 = vld [vmem:[#allocation8_spill] sm:$0xff]  ;;  %v4508_v41 = vld [vmem:[#allocation14_spill] sm:$0xff] }
 0x2be   : > { %v1916_v34 = vadd.f32 %v1915_v21, %v1730_v35  ;;  %v1745_v35 = vmax.f32 %v1463_v63, 0.0  ;;  %v1746_v21 = vmax.f32 %v1137_v44, 0.0  ;;  %v1751_v48 = vmax.f32 %v1471_v5, 0.0 }
 0x2bf   : > { %v2049_v28 = vadd.f32 %v2048_v10, %v1731_v6 }
 0x2c0   : > { %v1917_v38 = vadd.f32 %v1916_v34, %v1732_v11  ;;  %v4041_v11 = vpop.f32.mrf.mxu2 }
 0x2c1   : > { %v2050_v52 = vadd.f32 %v2049_v28, %v1733_v59  ;;  %v4045_v59 = vpop.f32.mrf.mxu3  ;;  %v1750_v28 = vmax.f32 %v1142_v8, 0.0  ;;  %v4510_v8 = vld [vmem:[#allocation16_spill] sm:$0xff] }
 0x2c2   : > { %v1918_v22 = vadd.f32 %v1917_v38, %v1734_v14  ;;  %v1147_v14 = vadd.f32 %v3659_v29, %v3410_v24  ;;  %v4501_v38 = vld [vmem:[#allocation6_spill] sm:$0xff] }
 0x2c3   : > { %v2051_v3 = vadd.f32 %v2050_v52, %v1735_v60  ;;  %v1476_v60 = vadd.f32 %v4501_v38, %v3413_v25  ;;  %v1752_v52 = vmax.f32 %v1144_v23, 0.0 }
 0x2c4   : > { %v1919_v54 = vadd.f32 %v1918_v22, %v1736_v46  ;;  %v1149_v46 = vadd.f32 %v4502_v4, %v3410_v24  ;;  %v1753_v22 = vmax.f32 %v1473_v33, 0.0 }
 0x2c5   : > { %v2052_v30 = vadd.f32 %v2051_v3, %v1737_v20  ;;  %v4503_v20 = vld [vmem:[#allocation7_spill] sm:$0xff]  ;;  %v1754_v3 = vmax.f32 %v1147_v14, 0.0  ;;  %v4513_v14 = vld [vmem:[#allocation17_spill] sm:$0xff] }
 0x2c6   : > { %v1920_v27 = vadd.f32 %v1919_v54, %v1738_v47  ;;  %v1478_v0 = vadd.f32 %v4503_v20, %v3413_v25  ;;  %v4504_v47 = vld [vmem:[#allocation10_spill] sm:$0xff]  ;;  %v1755_v54 = vmax.f32 %v1476_v60, 0.0  ;;  %v4514_v60 = vld [vmem:[#allocation20_spill] sm:$0xff] }
 0x2c7   : > { %v2053_v18 = vadd.f32 %v2052_v30, %v1739_v13  ;;  %v1152_v29 = vadd.f32 %v4504_v47, %v3410_v24  ;;  %v4505_v13 = vld [vmem:[#allocation9_spill] sm:$0xff] }
 0x2c8   : > { %v1921_v55 = vadd.f32 %v1920_v27, %v1740_v37  ;;  %v1481_v15 = vadd.f32 %v4505_v13, %v3413_v25  ;;  %v1756_v37 = vmax.f32 %v1149_v46, 0.0  ;;  %v1154_v27 = vadd.f32 %v4506_v1, %v3410_v24  ;;  %v4515_v46 = vld [vmem:[#allocation19_spill] sm:$0xff] }
 0x2c9   : > { %v2054_v32 = vadd.f32 %v2053_v18, %v1741_v57  ;;  %v1757_v63 = vmax.f32 %v1478_v0, 0.0  ;;  %v4507_v18 = vld [vmem:[#allocation11_spill] sm:$0xff]  ;;  %v4069_v56 = vpop.f32.mrf.mxu3  ;;  %v4516_v0 = vld [vmem:[#allocation22_spill] sm:$0xff] }
 0x2ca   : > { %v1922_v26 = vadd.f32 %v1921_v55, %v1742_v12  ;;  %v1483_v12 = vadd.f32 %v4507_v18, %v3413_v25  ;;  %v4065_v55 = vpop.f32.mrf.mxu2 }
 0x2cb   : > { %v2055_v40 = vadd.f32 %v2054_v32, %v1743_v49  ;;  %v1758_v49 = vmax.f32 %v1152_v29, 0.0  ;;  %v1157_v32 = vadd.f32 %v4508_v41, %v3410_v24  ;;  %v4517_v29 = vld [vmem:[#allocation21_spill] sm:$0xff] }
 0x2cc   : > { %v1923_v6 = vadd.f32 %v1922_v26, %v1744_v51  ;;  %v1759_v26 = vmax.f32 %v1481_v15, 0.0  ;;  %v1761_v5 = vmax.f32 %v1483_v12, 0.0 }
 0x2cd   : > { %v2056_v10 = vadd.f32 %v2055_v40, %v1745_v35  ;;  %v4509_v35 = vld [vmem:[#allocation13_spill] sm:$0xff] }
 0x2ce   : > { %v1924_v34 = vadd.f32 %v1923_v6, %v1746_v21  ;;  %v1486_v53 = vadd.f32 %v4509_v35, %v3413_v25  ;;  %v1760_v21 = vmax.f32 %v1154_v27, 0.0  ;;  %v1159_v6 = vadd.f32 %v4510_v8, %v3410_v24 }
 0x2cf   : > { %v2057_v43 = vadd.f32 %v2056_v10, %v1747_v50  ;;  %v4511_v10 = vld [vmem:[#allocation15_spill] sm:$0xff] }
 0x2d0   : > { %v1925_v39 = vadd.f32 %v1924_v34, %v1748_v36  ;;  %v1488_v36 = vadd.f32 %v4511_v10, %v3413_v25  ;;  %v1762_v34 = vmax.f32 %v1157_v32, 0.0  ;;  %v1764_v38 = vmax.f32 %v1159_v6, 0.0 }
 0x2d1   : > { %v2058_v45 = vadd.f32 %v2057_v43, %v1749_v19  ;;  %v4512_v19 = vld [vmem:[#allocation18_spill] sm:$0xff]  ;;  %v4093_v27 = vpop.f32.mrf.mxu3 }
 0x2d2   : > { %v1926_v61 = vadd.f32 %v1925_v39, %v1750_v28  ;;  %v1162_v33 = vadd.f32 %v4512_v19, %v3410_v24  ;;  %v1763_v28 = vmax.f32 %v1486_v53, 0.0  ;;  %v1491_v39 = vadd.f32 %v4513_v14, %v3413_v25  ;;  %v4089_v13 = vpop.f32.mrf.mxu2 }
 0x2d3   : > { %v2059_v58 = vadd.f32 %v2058_v45, %v1751_v48  ;;  %v1164_v45 = vadd.f32 %v4514_v60, %v3410_v24  ;;  %v1765_v4 = vmax.f32 %v1488_v36, 0.0 }
 0x2d4   : > { %v1927_v16 = vadd.f32 %v1926_v61, %v1752_v52  ;;  %v1493_v61 = vadd.f32 %v4515_v46, %v3413_v25  ;;  %v1766_v20 = vmax.f32 %v1162_v33, 0.0  ;;  %v1767_v47 = vmax.f32 %v1491_v39, 0.0 }
 0x2d5   : > { %v2060_v30 = vadd.f32 %v2059_v58, %v1753_v22  ;;  %v1167_v58 = vadd.f32 %v4516_v0, %v3410_v24  ;;  %v1768_v15 = vmax.f32 %v1164_v45, 0.0  ;;  %v4528_v0 = vld [vmem:[#allocation34_spill] sm:$0xff] }
 0x2d6   : > { %v1928_v57 = vadd.f32 %v1927_v16, %v1754_v3  ;;  %v1496_v16 = vadd.f32 %v4517_v29, %v3413_v25 }
 0x2d7   : > { %v2061_v44 = vadd.f32 %v2060_v30, %v1755_v54  ;;  %v4518_v30 = vld [vmem:[#allocation24_spill] sm:$0xff] }
 0x2d8   : > { %v1929_v51 = vadd.f32 %v1928_v57, %v1756_v37  ;;  %v1169_v37 = vadd.f32 %v4518_v30, %v3410_v24  ;;  %v1769_v57 = vmax.f32 %v1493_v61, 0.0 }
 0x2d9   : > { %v2062_v40 = vadd.f32 %v2061_v44, %v1757_v63  ;;  %v4519_v63 = vld [vmem:[#allocation23_spill] sm:$0xff]  ;;  %v1770_v44 = vmax.f32 %v1167_v58, 0.0  ;;  %v1182_v58 = vadd.f32 %v4528_v0, %v3410_v24 }
 0x2da   : > { %v1930_v50 = vadd.f32 %v1929_v51, %v1758_v49  ;;  %v1498_v18 = vadd.f32 %v4519_v63, %v3413_v25  ;;  %v4520_v49 = vld [vmem:[#allocation26_spill] sm:$0xff]  ;;  %v1771_v51 = vmax.f32 %v1496_v16, 0.0  ;;  %v4529_v16 = vld [vmem:[#allocation33_spill] sm:$0xff] }
 0x2db   : > { %v2063_v23 = vadd.f32 %v2062_v40, %v1759_v26  ;;  %v1172_v41 = vadd.f32 %v4520_v49, %v3410_v24  ;;  %v4521_v26 = vld [vmem:[#allocation25_spill] sm:$0xff]  ;;  %v1772_v40 = vmax.f32 %v1169_v37, 0.0  ;;  %v4530_v37 = vld [vmem:[#allocation36_spill] sm:$0xff]  ;;  %v1782_v49 = vmax.f32 %v1182_v58, 0.0 }
 0x2dc   : > { %v1931_v43 = vadd.f32 %v1930_v50, %v1760_v21  ;;  %v1501_v35 = vadd.f32 %v4521_v26, %v3413_v25  ;;  %v4522_v21 = vld [vmem:[#allocation28_spill] sm:$0xff]  ;;  %v1773_v50 = vmax.f32 %v1498_v18, 0.0  ;;  %v4531_v18 = vld [vmem:[#allocation35_spill] sm:$0xff] }
 0x2dd   : > { %v2064_v48 = vadd.f32 %v2063_v23, %v1761_v5  ;;  %v1174_v8 = vadd.f32 %v4522_v21, %v3410_v24  ;;  %v4523_v5 = vld [vmem:[#allocation27_spill] sm:$0xff]  ;;  %v1774_v23 = vmax.f32 %v1172_v41, 0.0  ;;  %v4532_v41 = vld [vmem:[#allocation38_spill] sm:$0xff] }
 0x2de   : > { %v1932_v52 = vadd.f32 %v1931_v43, %v1762_v34  ;;  %v1503_v10 = vadd.f32 %v4523_v5, %v3413_v25  ;;  %v4524_v34 = vld [vmem:[#allocation30_spill] sm:$0xff]  ;;  %v1775_v43 = vmax.f32 %v1501_v35, 0.0  ;;  %v4533_v35 = vld [vmem:[#allocation37_spill] sm:$0xff] }
 0x2df   : > { %v2065_v22 = vadd.f32 %v2064_v48, %v1763_v28  ;;  %v1177_v19 = vadd.f32 %v4524_v34, %v3410_v24  ;;  %v4525_v28 = vld [vmem:[#allocation29_spill] sm:$0xff]  ;;  %v1776_v48 = vmax.f32 %v1174_v8, 0.0  ;;  %v4534_v8 = vld [vmem:[#allocation40_spill] sm:$0xff] }
 0x2e0   : > { %v1933_v3 = vadd.f32 %v1932_v52, %v1764_v38  ;;  %v1506_v14 = vadd.f32 %v4525_v28, %v3413_v25  ;;  %v4526_v38 = vld [vmem:[#allocation32_spill] sm:$0xff]  ;;  %v1777_v52 = vmax.f32 %v1503_v10, 0.0  ;;  %v4535_v10 = vld [vmem:[#allocation39_spill] sm:$0xff] }
 0x2e1   : > { %v2066_v54 = vadd.f32 %v2065_v22, %v1765_v4  ;;  %v1179_v60 = vadd.f32 %v4526_v38, %v3410_v24  ;;  %v4527_v4 = vld [vmem:[#allocation31_spill] sm:$0xff]  ;;  %v4113_v22 = vpop.f32.mrf.mxu2 }
 0x2e2   : > { %v1934_v1 = vadd.f32 %v1933_v3, %v1766_v20  ;;  %v1508_v46 = vadd.f32 %v4527_v4, %v3413_v25  ;;  %v1778_v20 = vmax.f32 %v1177_v19, 0.0  ;;  %v1779_v29 = vmax.f32 %v1506_v14, 0.0  ;;  %v4536_v19 = vld [vmem:[#allocation42_spill] sm:$0xff]  ;;  %v4537_v14 = vld [vmem:[#allocation41_spill] sm:$0xff] }
 0x2e3   : > { %v2067_v12 = vadd.f32 %v2066_v54, %v1767_v47  ;;  %v4117_v47 = vpop.f32.mrf.mxu3  ;;  %v1511_v54 = vadd.f32 %v4529_v16, %v3413_v25  ;;  %v1780_v30 = vmax.f32 %v1179_v60, 0.0 }
 0x2e4   : > { %v1935_v32 = vadd.f32 %v1934_v1, %v1768_v15  ;;  %v1184_v1 = vadd.f32 %v4530_v37, %v3410_v24  ;;  %v1781_v63 = vmax.f32 %v1508_v46, 0.0 }
 0x2e5   : > { %v2068_v53 = vadd.f32 %v2067_v12, %v1769_v57  ;;  %v1513_v12 = vadd.f32 %v4531_v18, %v3413_v25  ;;  %v1783_v26 = vmax.f32 %v1511_v54, 0.0 }
 0x2e6   : > { %v1936_v6 = vadd.f32 %v1935_v32, %v1770_v44  ;;  %v1187_v32 = vadd.f32 %v4532_v41, %v3410_v24  ;;  %v1784_v21 = vmax.f32 %v1184_v1, 0.0 }
 0x2e7   : > { %v2069_v36 = vadd.f32 %v2068_v53, %v1771_v51  ;;  %v1516_v53 = vadd.f32 %v4533_v35, %v3413_v25  ;;  %v1785_v5 = vmax.f32 %v1513_v12, 0.0 }
 0x2e8   : > { %v1937_v33 = vadd.f32 %v1936_v6, %v1772_v40  ;;  %v1189_v6 = vadd.f32 %v4534_v8, %v3410_v24  ;;  %v1786_v34 = vmax.f32 %v1187_v32, 0.0 }
 0x2e9   : > { %v2070_v39 = vadd.f32 %v2069_v36, %v1773_v50  ;;  %v1518_v36 = vadd.f32 %v4535_v10, %v3413_v25  ;;  %v1787_v28 = vmax.f32 %v1516_v53, 0.0  ;;  %v4137_v38 = vpop.f32.mrf.mxu2 }
 0x2ea   : > { %v1938_v45 = vadd.f32 %v1937_v33, %v1774_v23  ;;  %v1192_v33 = vadd.f32 %v4536_v19, %v3410_v24  ;;  %v1788_v60 = vmax.f32 %v1189_v6, 0.0 }
 0x2eb   : > { %v2071_v61 = vadd.f32 %v2070_v39, %v1775_v43  ;;  %v1521_v39 = vadd.f32 %v4537_v14, %v3413_v25  ;;  %v4141_v46 = vpop.f32.mrf.mxu3 }
 0x2ec   : > { %v1939_v3 = vadd.f32 %v1938_v45, %v1776_v48  ;;  %v4538_v45 = vld [vmem:[#allocation44_spill] sm:$0xff] }
 0x2ed   : > { %v2072_v15 = vadd.f32 %v2071_v61, %v1777_v52  ;;  %v1194_v52 = vadd.f32 %v4538_v45, %v3410_v24  ;;  %v1789_v61 = vmax.f32 %v1518_v36, 0.0  ;;  %v4546_v36 = vld [vmem:[#allocation52_spill] sm:$0xff] }
 0x2ee   : > { %v1940_v57 = vadd.f32 %v1939_v3, %v1778_v20  ;;  %v4539_v20 = vld [vmem:[#allocation43_spill] sm:$0xff]  ;;  %v1790_v3 = vmax.f32 %v1192_v33, 0.0 }
 0x2ef   : > { %v2073_v44 = vadd.f32 %v2072_v15, %v1779_v29  ;;  %v1523_v0 = vadd.f32 %v4539_v20, %v3413_v25  ;;  %v4540_v29 = vld [vmem:[#allocation46_spill] sm:$0xff]  ;;  %v1791_v15 = vmax.f32 %v1521_v39, 0.0  ;;  %v2966_v39 = vld [vmem:[%s4432_s3 + $0x90] sm:$0xf] }
 0x2f0   : > { %v1941_v51 = vadd.f32 %v1940_v57, %v1780_v30  ;;  %v1197_v16 = vadd.f32 %v4540_v29, %v3410_v24  ;;  %v4541_v30 = vld [vmem:[#allocation45_spill] sm:$0xff]  ;;  %v1792_v57 = vmax.f32 %v1194_v52, 0.0  ;;  %v4548_v52 = vld [vmem:[#allocation54_spill] sm:$0xff] }
 0x2f1   : > { %v2074_v40 = vadd.f32 %v2073_v44, %v1781_v63  ;;  %v1526_v37 = vadd.f32 %v4541_v30, %v3413_v25  ;;  %v4542_v63 = vld [vmem:[#allocation48_spill] sm:$0xff]  ;;  %v1793_v44 = vmax.f32 %v1523_v0, 0.0 }
 0x2f2   : > { %v1942_v50 = vadd.f32 %v1941_v51, %v1782_v49  ;;  %v1199_v18 = vadd.f32 %v4542_v63, %v3410_v24  ;;  %v4543_v49 = vld [vmem:[#allocation47_spill] sm:$0xff]  ;;  %v1794_v51 = vmax.f32 %v1197_v16, 0.0 }
 0x2f3   : > { %v2075_v23 = vadd.f32 %v2074_v40, %v1783_v26  ;;  %v1528_v41 = vadd.f32 %v4543_v49, %v3413_v25  ;;  %v4544_v26 = vld [vmem:[#allocation50_spill] sm:$0xff]  ;;  %v1795_v40 = vmax.f32 %v1526_v37, 0.0  ;;  %v4177_v0 = vpop.f32.mrf.mxu3 }
 0x2f4   : > { %v1943_v43 = vadd.f32 %v1942_v50, %v1784_v21  ;;  %v1202_v35 = vadd.f32 %v4544_v26, %v3410_v24  ;;  %v4545_v21 = vld [vmem:[#allocation49_spill] sm:$0xff]  ;;  %v2902_v50 = vld [vmem:[%s4432_s3 + $0x10] sm:$0xf]  ;;  %v1796_v10 = vmax.f32 %v1199_v18, 0.0 }
 0x2f5   : > { %v2076_v48 = vadd.f32 %v2075_v23, %v1785_v5  ;;  %v1531_v8 = vadd.f32 %v4545_v21, %v3413_v25  ;;  %v3096_v5 = vld [vmem:[%s4432_s3 + $0x14] sm:$0xf0]  ;;  %v1204_v23 = vadd.f32 %v4546_v36, %v3410_v24  ;;  %v1797_v33 = vmax.f32 %v1528_v41, 0.0 }
 0x2f6   : > { %v1944_v4 = vadd.f32 %v1943_v43, %v1786_v34  ;;  %v2903_v19 = vor.u32 %v3096_v5, %v2902_v50  ;;  %v4547_v43 = vld [vmem:[#allocation51_spill] sm:$0xff]  ;;  %v1798_v45 = vmax.f32 %v1202_v35, 0.0 }
 0x2f7   : > { %v2077_v58 = vadd.f32 %v2076_v48, %v1787_v28  ;;  %v1533_v28 = vadd.f32 %v4547_v43, %v3413_v25  ;;  %v3112_v48 = vld [vmem:[%s4432_s3 + $0x94] sm:$0xf0]  ;;  %v4555_v50 = vld [vmem:[#allocation59_spill] sm:$0xff] }
 0x2f8   : > { %v1945_v54 = vadd.f32 %v1944_v4, %v1788_v60  ;;  %v4173_v60 = vpop.f32.mrf.mxu2  ;;  %v1207_v4 = vadd.f32 %v4548_v52, %v3410_v24  ;;  %2341 = vmatpush.bf16.msrb.mxu2 %v2903_v19  ;;  %v2967_v20 = vor.u32 %v3112_v48, %v2966_v39  ;;  %v1543_v5 = vadd.f32 %v4555_v50, %v3413_v25  ;;  %v4557_v19 = vld [vmem:[#allocation62_spill] sm:$0xff] }
 0x2f9   : > { %v2078_v1 = vadd.f32 %v2077_v58, %v1789_v61  ;;  %v1799_v58 = vmax.f32 %v1531_v8, 0.0 }
 0x2fa   : > { %v1946_v12 = vadd.f32 %v1945_v54, %v1790_v3  ;;  %v4549_v3 = vld [vmem:[#allocation53_spill] sm:$0xff]  ;;  %v1800_v54 = vmax.f32 %v1204_v23, 0.0  ;;  %2354 = vmatpush.bf16.msrb.mxu3 %v2967_v20  ;;  %v1809_v20 = vmax.f32 %v1543_v5, 0.0 }
 0x2fb   : > { %v2079_v32 = vadd.f32 %v2078_v1, %v1791_v15  ;;  %v1536_v29 = vadd.f32 %v4549_v3, %v3413_v25  ;;  %v4550_v15 = vld [vmem:[#allocation56_spill] sm:$0xff]  ;;  %v1801_v1 = vmax.f32 %v1533_v28, 0.0  ;;  %v4556_v23 = vld [vmem:[#allocation61_spill] sm:$0xff] }
 0x2fc   : > { %v1947_v53 = vadd.f32 %v1946_v12, %v1792_v57  ;;  %v1209_v30 = vadd.f32 %v4550_v15, %v3410_v24  ;;  %v4551_v57 = vld [vmem:[#allocation55_spill] sm:$0xff]  ;;  %v1802_v12 = vmax.f32 %v1207_v4, 0.0  ;;  %v4560_v15 = vld [vmem:[#allocation65_spill] sm:$0xff] }
 0x2fd   : > { %v2080_v6 = vadd.f32 %v2079_v32, %v1793_v44  ;;  %v1538_v63 = vadd.f32 %v4551_v57, %v3413_v25  ;;  %v4552_v44 = vld [vmem:[#allocation58_spill] sm:$0xff]  ;;  %v1803_v32 = vmax.f32 %v1536_v29, 0.0 }
 0x2fe   : > { %v1948_v34 = vadd.f32 %v1947_v53, %v1794_v51  ;;  %v1212_v49 = vadd.f32 %v4552_v44, %v3410_v24  ;;  %v4553_v51 = vld [vmem:[#allocation57_spill] sm:$0xff]  ;;  %v1804_v53 = vmax.f32 %v1209_v30, 0.0  ;;  %v1222_v30 = vadd.f32 %v4560_v15, %v3410_v24 }
 0x2ff   : > { %v2081_v14 = vadd.f32 %v2080_v6, %v1795_v40  ;;  %v1541_v26 = vadd.f32 %v4553_v51, %v3413_v25  ;;  %v4554_v40 = vld [vmem:[#allocation60_spill] sm:$0xff]  ;;  %v1805_v6 = vmax.f32 %v1538_v63, 0.0  ;;  %v2958_v44 = vld [vmem:[%s4432_s3 + $0x80] sm:$0xf]  ;;  %v1234_v15 = vadd.f32 %v4017_v62, %v3410_v24 }
 0x300   : > { %v1949_v61 = vadd.f32 %v1948_v34, %v1796_v10  ;;  %v1214_v21 = vadd.f32 %v4554_v40, %v3410_v24  ;;  %v1806_v36 = vmax.f32 %v1212_v49, 0.0  ;;  %v1546_v34 = vadd.f32 %v4556_v23, %v3413_v25  ;;  %v4197_v39 = vpop.f32.mrf.mxu2  ;;  %v4563_v40 = vld [vmem:[#allocation68_spill] sm:$0xff] }
 0x301   : > { %v2082_v16 = vadd.f32 %v2081_v14, %v1797_v33  ;;  %v1217_v33 = vadd.f32 %v4557_v19, %v3410_v24  ;;  %v1807_v28 = vmax.f32 %v1541_v26, 0.0  ;;  %v1814_v50 = vmax.f32 %v1222_v30, 0.0 }
 0x302   : > { %v1950_v37 = vadd.f32 %v1949_v61, %v1798_v45  ;;  %v1808_v48 = vmax.f32 %v1214_v21, 0.0  ;;  %v4558_v45 = vld [vmem:[#allocation63_spill] sm:$0xff]  ;;  %v4201_v61 = vpop.f32.mrf.mxu3  ;;  %v1553_v21 = vadd.f32 %v4563_v40, %v3413_v25  ;;  %v1556_v19 = vadd.f32 %v3964_v7, %v3413_v25 }
 0x303   : > { %v2083_v18 = vadd.f32 %v2082_v16, %v1799_v58  ;;  %v1219_v52 = vadd.f32 %v4558_v45, %v3410_v24  ;;  %v4559_v58 = vld [vmem:[#allocation64_spill] sm:$0xff]  ;;  %v1811_v16 = vmax.f32 %v1546_v34, 0.0  ;;  %v1558_v45 = vadd.f32 %v3977_v17, %v3413_v25 }
 0x304   : > { %v1951_v41 = vadd.f32 %v1950_v37, %v1800_v54  ;;  %v1548_v3 = vadd.f32 %v4559_v58, %v3413_v25  ;;  %v1810_v54 = vmax.f32 %v1217_v33, 0.0  ;;  %v1561_v58 = vadd.f32 %v3997_v9, %v3413_v25 }
 0x305   : > { %v2084_v35 = vadd.f32 %v2083_v18, %v1801_v1  ;;  %v4561_v1 = vld [vmem:[#allocation66_spill] sm:$0xff]  ;;  %v2894_v18 = vld [vmem:[%s4432_s3] sm:$0xf]  ;;  %v1812_v49 = vmax.f32 %v1219_v52, 0.0  ;;  %v1232_v7 = vadd.f32 %v3993_v42, %v3410_v24  ;;  %v1821_v30 = vmax.f32 %v1558_v45, 0.0 }
 0x306   : > { %v1952_v8 = vadd.f32 %v1951_v41, %v1802_v12  ;;  %v1551_v57 = vadd.f32 %v4561_v1, %v3413_v25  ;;  %v3094_v12 = vld [vmem:[%s4432_s3 + $0x4] sm:$0xf0]  ;;  %v4562_v41 = vld [vmem:[#allocation67_spill] sm:$0xff]  ;;  %v256_v1 = vlaneseq  ;;  %v1823_v9 = vmax.f32 %v1561_v58, 0.0 }
 0x307   : > { %v2085_v10 = vadd.f32 %v2084_v35, %v1803_v32  ;;  %v1224_v32 = vadd.f32 %v4562_v41, %v3410_v24  ;;  %v2895_v26 = vor.u32 %v3094_v12, %v2894_v18  ;;  %v3110_v35 = vld [vmem:[%s4432_s3 + $0x84] sm:$0xf0]  ;;  %v1237_v42 = vadd.f32 %v4041_v11, %v3410_v24 }
 0x308   : > { %v1953_v43 = vadd.f32 %v1952_v8, %v1804_v53  ;;  %v1813_v53 = vmax.f32 %v1548_v3, 0.0  ;;  %v1815_v23 = vmax.f32 %v1551_v57, 0.0  ;;  %v4233_v52 = vpop.f32.mrf.mxu2  ;;  %v1566_v12 = vadd.f32 %v4045_v59, %v3413_v25 }
 0x309   : > { %v2086_v14 = vadd.f32 %v2085_v10, %v1805_v6  ;;  %v2959_v6 = vor.u32 %v3110_v35, %v2958_v44  ;;  %v4564_v10 = vld [vmem:[#allocation69_spill] sm:$0xff]  ;;  %2342 = vmatpush.bf16.msrb.mxu2 %v2895_v26  ;;  %v1816_v33 = vmax.f32 %v1224_v32, 0.0  ;;  %vm4249_vm1 = vcmp.lt.s32.totalorder %v256_v1, 256 }
 0x30a   : > { %v1954_v4 = vadd.f32 %v1953_v43, %v1806_v36  ;;  %v1227_v36 = vadd.f32 %v4564_v10, %v3410_v24  ;;  %v4239_v3 = vpop.f32.mrf.mxu3  ;;  %v1239_v41 = vadd.f32 %v4065_v55, %v3410_v24  ;;  %v3265_v32 = vmov 0.0   ;;  %v2936_v1 = vld [vmem:[%s4432_s3 + $0x58] sm:$0xf0] }
 0x30b   : > { %v2087_v29 = vadd.f32 %v2086_v14, %v1807_v28  ;;  %2355 = vmatpush.bf16.msrb.mxu3 %v2959_v6  ;;  %v1229_v28 = vadd.f32 %v3975_v31, %v3410_v24  ;;  %v1817_v14 = vmax.f32 %v1553_v21, 0.0  ;;  %260 = vst.msk [vmem:[#allocation2] sm:$0x3] %vm4249_vm1, %v3265_v32  ;;  %v1242_v59 = vadd.f32 %v4089_v13, %v3410_v24 }
 0x30c   : > { %v1955_v37 = vadd.f32 %v1954_v4, %v1808_v48  ;;  %v1826_v35 = vmax.f32 %v1237_v42, 0.0  ;;  %v1827_v40 = vmax.f32 %v1566_v12, 0.0  ;;  %v1571_v21 = vadd.f32 %v4093_v27, %v3413_v25 }
 0x30d   : > { %v2088_v63 = vadd.f32 %v2087_v29, %v1809_v20  ;;  %v1818_v20 = vmax.f32 %v1227_v36, 0.0  ;;  %v1830_v13 = vmax.f32 %v1242_v59, 0.0  ;;  %v1249_v45 = vadd.f32 %v4173_v60, %v3410_v24  ;;  %v2944_v60 = vld [vmem:[%s4432_s3 + $0x68] sm:$0xf0] }
 0x30e   : > { %v1956_v51 = vadd.f32 %v1955_v37, %v1810_v54  ;;  %v1820_v54 = vmax.f32 %v1229_v28, 0.0  ;;  %v1563_v37 = vadd.f32 %v4021_v2, %v3413_v25  ;;  %v1568_v2 = vadd.f32 %v4069_v56, %v3413_v25 }
 0x30f   : > { %v2089_v8 = vadd.f32 %v2088_v63, %v1811_v16  ;;  %v1819_v16 = vmax.f32 %v1556_v19, 0.0  ;;  %v1822_v63 = vmax.f32 %v1232_v7, 0.0  ;;  %v1573_v56 = vadd.f32 %v4117_v47, %v3413_v25  ;;  %v3107_v47 = vld [vmem:[%s4432_s3 + $0x74] sm:$0xf]  ;;  %v2952_v19 = vld [vmem:[%s4432_s3 + $0x78] sm:$0xf0] }
 0x310   : > { %v1957_v5 = vadd.f32 %v1956_v51, %v1812_v49  ;;  %v1824_v49 = vmax.f32 %v1234_v15, 0.0  ;;  %v1825_v51 = vmax.f32 %v1563_v37, 0.0  ;;  %v1256_v55 = vpop.f32.mrf.mxu2  ;;  %v1829_v6 = vmax.f32 %v1568_v2, 0.0  ;;  %v3121_v15 = vld [vmem:[%s4432_s3 + $0xe4] sm:$0xf] }
 0x311   : > { %v2090_v34 = vadd.f32 %v2089_v8, %v1813_v53  ;;  %v1833_v28 = vmax.f32 %v1573_v56, 0.0  ;;  %v3103_v37 = vld [vmem:[%s4432_s3 + $0x54] sm:$0xf]  ;;  %v2992_v56 = vld [vmem:[%s4432_s3 + $0xc8] sm:$0xf0] }
 0x312   : > { %v1958_v43 = vadd.f32 %v1957_v5, %v1814_v50  ;;  %v1828_v50 = vmax.f32 %v1239_v41, 0.0  ;;  %v1244_v5 = vadd.f32 %v4113_v22, %v3410_v24  ;;  %v1585_v10 = vpop.f32.mrf.mxu3  ;;  %v3123_v22 = vld [vmem:[%s4432_s3 + $0xf4] sm:$0xf]  ;;  %v2939_v41 = vor.u32 %v3103_v37, %v2936_v1 }
 0x313   : > { %v2091_v48 = vadd.f32 %v2090_v34, %v1815_v23  ;;  %v1576_v23 = vadd.f32 %v4141_v46, %v3413_v25  ;;  %v1247_v34 = vadd.f32 %v4137_v38, %v3410_v24  ;;  %v2955_v46 = vor.u32 %v3107_v47, %v2952_v19  ;;  %v3016_v38 = vld [vmem:[%s4432_s3 + $0xf8] sm:$0xf0] }
 0x314   : > { %v1959_v4 = vadd.f32 %v1958_v43, %v1816_v33  ;;  %v1831_v43 = vmax.f32 %v1571_v21, 0.0  ;;  %v3117_v21 = vld [vmem:[%s4432_s3 + $0xc4] sm:$0xf] }
 0x315   : > { %v2092_v29 = vadd.f32 %v2091_v48, %v1817_v14  ;;  %v1832_v48 = vmax.f32 %v1244_v5, 0.0  ;;  %v1835_v58 = vmax.f32 %v1576_v23, 0.0  ;;  %v1834_v7 = vmax.f32 %v1247_v34, 0.0  ;;  %2361 = vmatpush.bf16.msra.mxu2 %v2955_v46  ;;  %v3115_v46 = vld [vmem:[%s4432_s3 + $0xb4] sm:$0xf] }
 0x316   : > { %v1960_v31 = vadd.f32 %v1959_v4, %v1818_v20  ;;  %v3019_v4 = vor.u32 %v3123_v22, %v3016_v38  ;;  %v2995_v34 = vor.u32 %v3117_v21, %v2992_v56 }
 0x317   : > { %v2093_v17 = vadd.f32 %v2092_v29, %v1819_v16  ;;  %v1578_v29 = vadd.f32 %v4177_v0, %v3413_v25  ;;  %v1581_v0 = vadd.f32 %v4201_v61, %v3413_v25  ;;  %v3119_v61 = vld [vmem:[%s4432_s3 + $0xd4] sm:$0xf] }
 0x318   : > { %v1961_v57 = vadd.f32 %v1960_v31, %v1820_v54  ;;  %v1252_v31 = vadd.f32 %v4197_v39, %v3410_v24  ;;  %2374 = vmatpush.bf16.msra.mxu3 %v3019_v4  ;;  %v3105_v54 = vld [vmem:[%s4432_s3 + $0x64] sm:$0xf]  ;;  %v3008_v39 = vld [vmem:[%s4432_s3 + $0xe8] sm:$0xf0]  ;;  %v1258_v2 = vpop.f32.mrf.mxu2 }
 0x319   : > { %v2094_v18 = vadd.f32 %v2093_v17, %v1821_v30  ;;  %v2947_v30 = vor.u32 %v3105_v54, %v2944_v60  ;;  %v3011_v42 = vor.u32 %v3121_v15, %v3008_v39  ;;  %v3095_v15 = vld [vmem:[%s4432_s3 + $0x14] sm:$0xf]  ;;  %v2968_v39 = vld [vmem:[%s4432_s3 + $0x98] sm:$0xf0] }
 0x31a   : > { %v1962_v62 = vadd.f32 %v1961_v57, %v1822_v63  ;;  %v1254_v63 = vadd.f32 %v4233_v52, %v3410_v24  ;;  %v1257_v52 = vadd.f32 %v1256_v55, %v3410_v24 }
 0x31b   : > { %v2095_v11 = vadd.f32 %v2094_v18, %v1823_v9  ;;  %v1836_v9 = vmax.f32 %v1249_v45, 0.0  ;;  %v3000_v18 = vld [vmem:[%s4432_s3 + $0xd8] sm:$0xf0]  ;;  %2362 = vmatpush.bf16.msra.mxu2 %v2947_v30  ;;  %v3111_v30 = vld [vmem:[%s4432_s3 + $0x94] sm:$0xf] }
 0x31c   : > { %v1963_v26 = vadd.f32 %v1962_v62, %v1824_v49  ;;  %v1837_v62 = vmax.f32 %v1578_v29, 0.0  ;;  %v1583_v49 = vadd.f32 %v4239_v3, %v3413_v25  ;;  %2375 = vmatpush.bf16.msra.mxu3 %v3011_v42  ;;  %v3003_v59 = vor.u32 %v3119_v61, %v3000_v18  ;;  %v3093_v42 = vld [vmem:[%s4432_s3 + $0x4] sm:$0xf]  ;;  %v2896_v61 = vld [vmem:[%s4432_s3 + $0x8] sm:$0xf0] }
 0x31d   : > { %v2096_v53 = vadd.f32 %v2095_v11, %v1825_v51  ;;  %v1838_v11 = vmax.f32 %v1252_v31, 0.0  ;;  %v1587_v51 = vpop.f32.mrf.mxu3  ;;  %v1839_v3 = vmax.f32 %v1581_v0, 0.0  ;;  %v2976_v31 = vld [vmem:[%s4432_s3 + $0xa8] sm:$0xf0] }
 0x31e   : > { %v1964_v8 = vadd.f32 %v1963_v26, %v1826_v35  ;;  %v3101_v26 = vld [vmem:[%s4432_s3 + $0x44] sm:$0xf]  ;;  %v2928_v35 = vld [vmem:[%s4432_s3 + $0x48] sm:$0xf0]  ;;  %v1841_v5 = vmax.f32 %v1583_v49, 0.0 }
 0x31f   : > { %v2097_v36 = vadd.f32 %v2096_v53, %v1827_v40  ;;  %v1586_v40 = vadd.f32 %v1585_v10, %v3413_v25  ;;  %2363 = vmatpush.bf16.msra.mxu2 %v2939_v41  ;;  %v1842_v10 = vmax.f32 %v1257_v52, 0.0  ;;  %v2899_v41 = vor.u32 %v3093_v42, %v2896_v61 }
 0x320   : > { %v1965_v27 = vadd.f32 %v1964_v8, %v1828_v50  ;;  %v1840_v8 = vmax.f32 %v1254_v63, 0.0  ;;  %2376 = vmatpush.bf16.msra.mxu3 %v3003_v59  ;;  %v2971_v63 = vor.u32 %v3111_v30, %v2968_v39 }
 0x321   : > { %v2098_v33 = vadd.f32 %v2097_v36, %v1829_v6  ;;  %v1259_v6 = vadd.f32 %v1258_v2, %v3410_v24  ;;  %v1588_v36 = vadd.f32 %v1587_v51, %v3413_v25  ;;  %v1843_v47 = vmax.f32 %v1586_v40, 0.0  ;;  %v3099_v24 = vld [vmem:[%s4432_s3 + $0x34] sm:$0xf]  ;;  %v2920_v25 = vld [vmem:[%s4432_s3 + $0x38] sm:$0xf0] }
 0x322   : > { %v1966_v14 = vadd.f32 %v1965_v27, %v1830_v13  ;;  %v2931_v13 = vor.u32 %v3101_v26, %v2928_v35  ;;  %v1846_v51 = vld [vmem:[#allocation2] sm:$0x3] }
 0x323   : > { %v2099_v20 = vadd.f32 %v2098_v33, %v1831_v43  ;;  %v1844_v22 = vmax.f32 %v1259_v6, 0.0  ;;  %v1845_v43 = vmax.f32 %v1588_v36, 0.0 }
 0x324   : > { %v1967_v16 = vadd.f32 %v1966_v14, %v1832_v48  ;;  %2364 = vmatpush.bf16.msra.mxu2 %v2931_v13  ;;  %2377 = vmatpush.bf16.msra.mxu3 %v2995_v34  ;;  %v2923_v14 = vor.u32 %v3099_v24, %v2920_v25  ;;  %v2984_v48 = vld [vmem:[%s4432_s3 + $0xb8] sm:$0xf0] }
 0x325   : > { %v2100_v17 = vadd.f32 %v2099_v20, %v1833_v28  ;;  %v2987_v4 = vor.u32 %v3115_v46, %v2984_v48  ;;  %v3097_v20 = vld [vmem:[%s4432_s3 + $0x24] sm:$0xf] }
 0x326   : > { %v1968_v57 = vadd.f32 %v1967_v16, %v1834_v7  ;;  %v3113_v16 = vld [vmem:[%s4432_s3 + $0xa4] sm:$0xf] }
 0x327   : > { %v2101_v12 = vadd.f32 %v2100_v17, %v1835_v58  ;;  %v2912_v58 = vld [vmem:[%s4432_s3 + $0x28] sm:$0xf0]  ;;  %v2979_v60 = vor.u32 %v3113_v16, %v2976_v31  ;;  %v2904_v17 = vld [vmem:[%s4432_s3 + $0x18] sm:$0xf0] }
 0x328   : > { %v1969_v32 = vadd.f32 %v1968_v57, %v1836_v9  ;;  %2365 = vmatpush.bf16.msra.mxu2 %v2923_v14  ;;  %v2915_v29 = vor.u32 %v3097_v20, %v2912_v58  ;;  %2378 = vmatpush.bf16.msra.mxu3 %v2987_v4  ;;  %v2907_v57 = vor.u32 %v3095_v15, %v2904_v17 }
 0x329   : > { %v2102_v53 = vadd.f32 %v2101_v12, %v1837_v62  ;;  %v3109_v12 = vld [vmem:[%s4432_s3 + $0x84] sm:$0xf]  ;;  %v2960_v62 = vld [vmem:[%s4432_s3 + $0x88] sm:$0xf0] }
 0x32a   : > { %v1970_v55 = vadd.f32 %v1969_v32, %v1838_v11  ;;  %v2963_v32 = vor.u32 %v3109_v12, %v2960_v62 }
 0x32b   : > { %v2103_v50 = vadd.f32 %v2102_v53, %v1839_v3 }
 0x32c   : > { %v1971_v23 = vadd.f32 %v1970_v55, %v1840_v8  ;;  %2366 = vmatpush.bf16.msra.mxu2 %v2915_v29  ;;  %2379 = vmatpush.bf16.msra.mxu3 %v2979_v60 }
 0x32d   : > { %v2104_v27 = vadd.f32 %v2103_v50, %v1841_v5  ;;  %v2169_v50 = vld [vmem:[%s4433_s4] sm:$0x3] }
 0x32e   : > { %v1972_v19 = vadd.f32 %v1971_v23, %v1842_v10  ;;  %v2331_v13 = vperm.slane %v2169_v50, 0  ;;  %v2332_v23 = vperm.slane %v2169_v50, 1 }
 0x32f   : > { %v2105_v33 = vadd.f32 %v2104_v27, %v1843_v47 }
 0x330   : > { %v1973_v28 = vadd.f32 %v1972_v19, %v1844_v22  ;;  %2367 = vmatpush.bf16.msra.mxu2 %v2907_v57  ;;  %2380 = vmatpush.bf16.msra.mxu3 %v2971_v63 }
 0x331   : > { %v2106_v38 = vadd.f32 %v2105_v33, %v1845_v43 }
 0x332   : > { %v1974_v45 = vrot.slane %v1973_v28, 4 }
 0x333   : > { %v2107_v7 = vrot.slane %v2106_v38, 4 }
 0x334   : > { %v1975_v54 = vadd.f32 %v1974_v45, %v1973_v28  ;;  %2368 = vmatpush.bf16.msra.mxu2 %v2899_v41  ;;  %2381 = vmatpush.bf16.msra.mxu3 %v2963_v32 }
 0x335   : > { %v2108_v0 = vadd.f32 %v2107_v7, %v2106_v38 }
 0x336   : > { %v1976_v37 = vrot.slane %v1975_v54, 2 }
 0x337   : > { %v2109_v1 = vrot.slane %v2108_v0, 2 }
 0x338   : > { %v1977_v9 = vadd.f32 %v1976_v37, %v1975_v54 }
 0x339   : > { %v2110_v18 = vadd.f32 %v2109_v1, %v2108_v0 }
 0x33a   : > { %v1978_v2 = vrot.slane %v1977_v9, 1 }
 0x33b   : > { %v2111_v49 = vrot.slane %v2110_v18, 1 }
 0x33c   : > { %v1979_v59 = vadd.f32 %v1978_v2, %v1977_v9 }
 0x33d   : > { %v2112_v11 = vadd.f32 %v2111_v49, %v2110_v18 }
 0x33f   : > { %v2115_v52 = vrot.slane %v2112_v11, 7 }
 0x341   : > { %v2117_v26 = vsel %vm2116_vm2, %v1979_v59, %v2115_v52 }
 0x342   : > { %v2119_v35 = vadd.f32 %v2117_v26, %v1846_v51 }
 0x344   : > { %2124 = vst.msk [vmem:[#allocation2] sm:$0x3] %vm4249_vm1, %v2119_v35 }
 0x34b   : > { %v2128_v53 = vld [vmem:[#allocation2] sm:$0x3] }
 0x34c   : > { %v2129_v3 = vmul.f32 0.0009765625, %v2128_v53 }
 0x34e   : > { %v2131_v40 = vperm.slane %v2129_v3, 0  ;;  %v2132_v21 = vperm.slane %v2129_v3, 1 }
 0x350   : > { %v2135_v56 = vpack.c.bf16 %v2131_v40, %v2131_v40  ;;  %v2136_v55 = vpack.c.bf16 %v2132_v21, %v2132_v21 }
 0x352   : > { %2343 = vmatmul.bf16.vlgmr.msrb.gmra.mxu2 %v2135_v56  ;;  %2356 = vmatmul.bf16.vlgmr.msrb.gmra.mxu3 %v2136_v55 }
 0x362   : > { %2369 = vmatmul.bf16.vlgmr.msra.gmra.mxu2 %v2135_v56  ;;  %2382 = vmatmul.bf16.vlgmr.msra.gmra.mxu3 %v2136_v55 }
 0x3d5   : > { %v2344_v8 = vpop.f32.mrf.mxu2  ;;  %v2357_v6 = vpop.f32.mrf.mxu3 }
 0x3d6   : > { %v2345_v10 = vadd.f32 %v2344_v8, %v2331_v13 }
 0x3d8   : > { %v2358_v19 = vadd.f32 %v2357_v6, %v2345_v10 }
 0x3da   : > { %v2387_v43 = vmax.f32 %v2358_v19, 0.0 }
 0x3dd   : > { %v2346_v5 = vpop.f32.mrf.mxu2  ;;  %v2359_v36 = vpop.f32.mrf.mxu3 }
 0x3e5   : > { %v2370_v34 = vpop.f32.mrf.mxu2  ;;  %v2383_v27 = vpop.f32.mrf.mxu3 }
 0x3e6   : > { %v2371_v47 = vadd.f32 %v2370_v34, %v2332_v23 }
 0x3e8   : > { %v2384_v22 = vadd.f32 %v2383_v27, %v2371_v47 }
 0x3ea   : > { %v2388_v33 = vmax.f32 %v2384_v22, 0.0 }
 0x3ec   : > { %v2391_v28 = vrot.slane %v2388_v33, 7 }
 0x3ed   : > { %v2372_v24 = vpop.f32.mrf.mxu2  ;;  %v2385_v25 = vpop.f32.mrf.mxu3 }
 0x3ee   : > { %v2392_v46 = vsel %vm2116_vm2, %v2387_v43, %v2391_v28 }
 0x3ef   : > { %2394 = vst.msk [vmem:[%s240_s24] sm:$0x3] %vm4249_vm1, %v2392_v46 }
 0x3f0   : > { %3212 = shalt.err (!%p3209_p5)
}
 0x3f1   : > { %3129 = dma.vmem_to_hbm [thread:$0]  (%p3336_p4), %s2409_s25, 32, %s2411_s27, %s2396_s21  }
 0x3f2 PF: > { %p3135_p6 = scmp.ge.s32.totalorder %s3263_s23, 2  ;;  %s2422_s13 = sand.u32 1, %s3243_s18  }
 0x3f3   : > { %s2423_s15 = scalar_lea.sflag [#allocation4], %s2422_s13 }
 0x3f4   : > { %p3132_p7 = pnand %p3135_p6, %p3343_p8 }
 0x3f6   : > { %p3133_p9 = pneg %p3132_p7 }
 0x3f8   : > { %3238 = dma.done.wait (%p3133_p9), %s2423_s15, 32  }
 0x3f9   : > { %3240 = vsyncadd (%p3133_p9), %s2423_s15, 4294967264  ;;  %s18_s23 = sadd.s32 1, %s3263_s23   ;;  %s4567_s18 = smov %s3247_s19 }
 0x3fa   : > { %p15_p10 = scmp.ge.s32.totalorder %s18_s23, 4   ;;  %s4568_s19 = smov %s3251_s20 }
 0x3fb   : > { %s4569_s20 = smov %s3349_s6  ;;  %s4570_s21 = smov %s3259_s22 }
 0x3fc   : > { %s4571_s22 = smov %s4573_s26  ;;  %17 = sbr.rel (!%p15_p10) target bundleno = 4 (0x4), region = 83 }
 0x401   :  { %2429 = vsyncpa [#allocation4], 1 }
 0x402   :  { %2431 = vsyncpa [#allocation4 + $0x1], 1 }

</bundles_post_ra>
